<compile_context>
chip_gen: v7x
topology: tpu7x:2x2x1
jax: 0.10.0
libtpu: 0.0.40
codegen_flags: <defaults>
</compile_context>

<pallas_src>
import math
import functools

import jax
import jax.numpy as jnp
from jax.experimental import pallas as pl
from jax.experimental.pallas import tpu as pltpu


# Keep <= 64 MiB so the same setting is valid on v7x; raise on v5e/v6e when
# using larger blocks.
_DEFAULT_VMEM_LIMIT = 48 * 1024 * 1024


def _l2norm(x, eps):
    # EfficientL2Norm: x * rsqrt(sum(x^2, -1) + eps)
    return x * jax.lax.rsqrt(jnp.sum(x * x, axis=-1, keepdims=True) + eps)


# --------------------------------------------------------------------------
# Kernel 1: fused QKV projection (tiled over the hidden contraction) + RoPE
#           + L2-norm + sqk scale.  softmax_scale is folded into q.
#           Outputs are head-major: q (B, nh, T, hd), k/v (B, nkv, T, hd).
# --------------------------------------------------------------------------
def qkv_rope_norm_kernel(x_ref, wqkv_ref, sqk_ref, cos_ref, sin_ref,
                         q_ref, k_ref, v_ref, acc_sc, *,
                         num_heads, num_kv_heads, head_dim, eps,
                         softmax_scale):
    kh = pl.program_id(2)
    tp = x_ref.shape[1]
    H = num_heads * head_dim
    kvd = num_kv_heads * head_dim
    half = head_dim // 2

    @pl.when(kh == 0)
    def _init():
        acc_sc[...] = jnp.zeros_like(acc_sc)

    # Partial product for this slice of the hidden contraction
    # (bf16 MXU operands, f32 accumulation).
    acc_sc[...] += jnp.dot(x_ref[0], wqkv_ref[...],
                           preferred_element_type=jnp.float32)

    @pl.when(kh == pl.num_programs(2) - 1)
    def _finalize():
        qkv = acc_sc[...]                              # (tp, H + 2*kvd) f32
        cos2 = cos_ref[...]                            # (tp, hd)  = [cos, cos]
        sin2 = sin_ref[...]                            # (tp, hd)  = [-sin, sin]

        def rope_norm(t, n, scale):
            # (tp, n*hd) -> head-major (n, tp, hd) with RoPE + L2 norm + sqk
            t = jnp.swapaxes(t.reshape(tp, n, head_dim), 0, 1)   # (n, tp, hd)
            # rotate-half; the sign is carried by the precomputed sin table
            t_rot = jnp.concatenate([t[..., half:], t[..., :half]], axis=-1)
            r = t * cos2[None, :, :] + t_rot * sin2[None, :, :]
            r = r * jax.lax.rsqrt(jnp.sum(r * r, axis=-1, keepdims=True) + eps)
            return r * (sqk_ref[...] * scale)          # (1, hd) broadcast

        q_ref[0] = rope_norm(qkv[:, :H], num_heads,
                             softmax_scale).astype(q_ref.dtype)
        k_ref[0] = rope_norm(qkv[:, H:H + kvd], num_kv_heads,
                             1.0).astype(k_ref.dtype)
        v = jnp.swapaxes(
            qkv[:, H + kvd:].reshape(tp, num_kv_heads, head_dim), 0, 1)
        v_ref[0] = v.astype(v_ref.dtype)


def _qkv_rope_norm(x, wqkv_t, sqk_eff, cos_full, sin_signed, *,
                   num_heads, num_kv_heads, head_dim, norm_eps,
                   softmax_scale, block_t, block_k, vmem_limit_bytes):
    B, T, H = x.shape
    kv_dim = num_kv_heads * head_dim
    out_dim = H + 2 * kv_dim
    bt = min(block_t, T)
    bk = min(block_k, H)
    assert T % bt == 0 and H % bk == 0

    kernel = functools.partial(
        qkv_rope_norm_kernel,
        num_heads=num_heads, num_kv_heads=num_kv_heads, head_dim=head_dim,
        eps=norm_eps, softmax_scale=softmax_scale)

    return pl.pallas_call(
        kernel,
        out_shape=(
            jax.ShapeDtypeStruct((B, num_heads, T, head_dim), x.dtype),
            jax.ShapeDtypeStruct((B, num_kv_heads, T, head_dim), x.dtype),
            jax.ShapeDtypeStruct((B, num_kv_heads, T, head_dim), x.dtype),
        ),
        grid_spec=pltpu.PrefetchScalarGridSpec(
            num_scalar_prefetch=0,
            grid=(B, T // bt, H // bk),
            in_specs=[
                pl.BlockSpec((1, bt, bk), lambda b, t, kh: (b, t, kh)),
                pl.BlockSpec((bk, out_dim), lambda b, t, kh: (kh, 0)),
                pl.BlockSpec((1, head_dim), lambda b, t, kh: (0, 0)),
                pl.BlockSpec((bt, head_dim), lambda b, t, kh: (t, 0)),
                pl.BlockSpec((bt, head_dim), lambda b, t, kh: (t, 0)),
            ],
            out_specs=(
                pl.BlockSpec((1, num_heads, bt, head_dim),
                             lambda b, t, kh: (b, 0, t, 0)),
                pl.BlockSpec((1, num_kv_heads, bt, head_dim),
                             lambda b, t, kh: (b, 0, t, 0)),
                pl.BlockSpec((1, num_kv_heads, bt, head_dim),
                             lambda b, t, kh: (b, 0, t, 0)),
            ),
            scratch_shapes=[pltpu.VMEM((bt, out_dim), jnp.float32)],
        ),
        compiler_params=pltpu.CompilerParams(
            dimension_semantics=("parallel", "parallel", "arbitrary"),
            vmem_limit_bytes=vmem_limit_bytes),
    )(x, wqkv_t, sqk_eff, cos_full, sin_signed)


# --------------------------------------------------------------------------
# Kernel 2: flash-style causal attention on a triangular (qi, ki) pair grid.
#           Head-major tiles, GQA without K/V broadcast, mask only on the
#           diagonal tile, lane-dense m/l scratch.
# --------------------------------------------------------------------------
def flash_attn_kernel(qi_ref, ki_ref, q_ref, k_ref, v_ref, o_ref,
                      m_sc, l_sc, acc_sc, *, num_kv_heads, groups, head_dim):
    n = pl.program_id(1)
    qi = qi_ref[n]
    ki = ki_ref[n]
    tq = q_ref.shape[2]
    tk = k_ref.shape[2]

    @pl.when(ki == 0)
    def _init():
        m_sc[...] = jnp.full(m_sc.shape, -jnp.inf, dtype=m_sc.dtype)
        l_sc[...] = jnp.zeros_like(l_sc)
        acc_sc[...] = jnp.zeros_like(acc_sc)

    def tile_update(apply_mask):
        # head-major tiles; K/V stay at num_kv_heads width (no broadcast_to)
        q = q_ref[0].reshape(num_kv_heads, groups, tq, head_dim)   # bf16
        k = k_ref[0]                                               # (nkv,tk,hd)
        v = v_ref[0]
        # softmax_scale and sqk are already folded into q (kernel 1)
        s = jnp.einsum('ugqd,ukd->ugqk', q, k,
                       preferred_element_type=jnp.float32)         # (nkv,g,tq,tk)
        if apply_mask:  # only the diagonal tile pays for the mask
            row = jax.lax.broadcasted_iota(jnp.int32, (tq, tk), 0)
            col = jax.lax.broadcasted_iota(jnp.int32, (tq, tk), 1)
            s = jnp.where((row >= col)[None, None], s, -1e30)

        m_prev = m_sc[...]                                         # (nkv,g,tq)
        m_new = jnp.maximum(m_prev, jnp.max(s, axis=-1))
        alpha = jnp.exp(m_prev - m_new)
        p = jnp.exp(s - m_new[..., None])                          # f32
        l_sc[...] = alpha * l_sc[...] + jnp.sum(p, axis=-1)
        acc_sc[...] = alpha[..., None] * acc_sc[...] + jnp.einsum(
            'ugqk,ukd->ugqd', p.astype(v.dtype), v,
            preferred_element_type=jnp.float32)
        m_sc[...] = m_new

    @pl.when(ki < qi)
    def _off_diag():
        tile_update(apply_mask=False)

    @pl.when(ki == qi)  # diagonal tile: masked update + finalize
    def _diag_and_finalize():
        tile_update(apply_mask=True)
        inv_l = pl.reciprocal(l_sc[...], approx=True)              # (nkv,g,tq)
        o = acc_sc[...] * inv_l[..., None]                         # (nkv,g,tq,hd)
        o_ref[0] = o.reshape(num_kv_heads * groups, tq,
                             head_dim).astype(o_ref.dtype)


def _flash_attention(q, k, v, *, num_heads, num_kv_heads, head_dim, block_q,
                     vmem_limit_bytes):
    B, NH, T, HD = q.shape
    assert NH == num_heads and HD == head_dim
    groups = num_heads // num_kv_heads
    blk = min(block_q, T)
    assert T % blk == 0
    nq = T // blk

    # Lower-triangular (qi, ki) pairs; ki ascends within each qi so the
    # diagonal tile is the last contribution for every q tile.
    pairs = [(i, j) for i in range(nq) for j in range(i + 1)]
    qi_idx = jnp.asarray([p[0] for p in pairs], dtype=jnp.int32)
    ki_idx = jnp.asarray([p[1] for p in pairs], dtype=jnp.int32)
    n_pairs = len(pairs)

    kernel = functools.partial(
        flash_attn_kernel,
        num_kv_heads=num_kv_heads, groups=groups, head_dim=head_dim)

    return pl.pallas_call(
        kernel,
        out_shape=jax.ShapeDtypeStruct((B, num_heads, T, head_dim), q.dtype),
        grid_spec=pltpu.PrefetchScalarGridSpec(
            num_scalar_prefetch=2,
            grid=(B, n_pairs),
            in_specs=[
                pl.BlockSpec((1, num_heads, blk, head_dim),
                             lambda b, n, qi, ki: (b, 0, qi[n], 0)),
                pl.BlockSpec((1, num_kv_heads, blk, head_dim),
                             lambda b, n, qi, ki: (b, 0, ki[n], 0)),
                pl.BlockSpec((1, num_kv_heads, blk, head_dim),
                             lambda b, n, qi, ki: (b, 0, ki[n], 0)),
            ],
            out_specs=pl.BlockSpec((1, num_heads, blk, head_dim),
                                   lambda b, n, qi, ki: (b, 0, qi[n], 0)),
            scratch_shapes=[
                pltpu.VMEM((num_kv_heads, groups, blk), jnp.float32),      # m
                pltpu.VMEM((num_kv_heads, groups, blk), jnp.float32),      # l
                pltpu.VMEM((num_kv_heads, groups, blk, head_dim),
                           jnp.float32),                                   # acc
            ],
        ),
        compiler_params=pltpu.CompilerParams(
            dimension_semantics=("parallel", "arbitrary"),
            vmem_limit_bytes=vmem_limit_bytes),
    )(qi_idx, ki_idx, q, k, v)


# --------------------------------------------------------------------------
# Kernel 3: o_proj as a per-head reduction (W_o streamed in head_dim-row
#           slabs, never fully resident) + output L2-norm at finalize.
# --------------------------------------------------------------------------
def oproj_outnorm_kernel(o_ref, wo_ref, out_ref, acc_sc, *, eps):
    h = pl.program_id(2)

    @pl.when(h == 0)
    def _init():
        acc_sc[...] = jnp.zeros_like(acc_sc)

    acc_sc[...] += jnp.dot(o_ref[0, 0], wo_ref[...],
                           preferred_element_type=jnp.float32)

    @pl.when(h == pl.num_programs(2) - 1)
    def _finalize():
        y = acc_sc[...]
        y = y * jax.lax.rsqrt(jnp.sum(y * y, axis=-1, keepdims=True) + eps)
        out_ref[0] = y.astype(out_ref.dtype)


def _oproj_outnorm(o, wo_t, *, norm_eps, block_t, vmem_limit_bytes):
    B, NH, T, HD = o.shape
    H = NH * HD
    bt = min(block_t, T)
    assert T % bt == 0

    kernel = functools.partial(oproj_outnorm_kernel, eps=norm_eps)

    return pl.pallas_call(
        kernel,
        out_shape=jax.ShapeDtypeStruct((B, T, H), o.dtype),
        grid_spec=pltpu.PrefetchScalarGridSpec(
            num_scalar_prefetch=0,
            grid=(B, T // bt, NH),
            in_specs=[
                pl.BlockSpec((1, 1, bt, HD), lambda b, t, h: (b, h, t, 0)),
                pl.BlockSpec((HD, H), lambda b, t, h: (h, 0)),
            ],
            out_specs=pl.BlockSpec((1, bt, H), lambda b, t, h: (b, t, 0)),
            scratch_shapes=[pltpu.VMEM((bt, H), jnp.float32)],
        ),
        compiler_params=pltpu.CompilerParams(
            dimension_semantics=("parallel", "parallel", "arbitrary"),
            vmem_limit_bytes=vmem_limit_bytes),
    )(o, wo_t)


# --------------------------------------------------------------------------
# Forward wrapper
# --------------------------------------------------------------------------
def attention_forward(x, wqkv_t, wo_t, sqk_eff, cos_full, sin_signed, *,
                      num_heads, num_kv_heads, head_dim, norm_eps,
                      block_t=256, block_k=512, block_q=128, block_t_out=512,
                      vmem_limit_bytes=_DEFAULT_VMEM_LIMIT):
    assert num_heads % num_kv_heads == 0
    softmax_scale = math.sqrt(head_dim)   # nGPT: sqrt(d), not 1/sqrt(d)
    q, k, v = _qkv_rope_norm(
        x, wqkv_t, sqk_eff, cos_full, sin_signed,
        num_heads=num_heads, num_kv_heads=num_kv_heads, head_dim=head_dim,
        norm_eps=norm_eps, softmax_scale=softmax_scale,
        block_t=block_t, block_k=block_k, vmem_limit_bytes=vmem_limit_bytes)
    o = _flash_attention(
        q, k, v,
        num_heads=num_heads, num_kv_heads=num_kv_heads, head_dim=head_dim,
        block_q=block_q, vmem_limit_bytes=vmem_limit_bytes)
    return _oproj_outnorm(
        o, wo_t, norm_eps=norm_eps, block_t=block_t_out,
        vmem_limit_bytes=vmem_limit_bytes)


# --------------------------------------------------------------------------
# Pure-JAX reference mirroring the PyTorch forward (no cache, dense causal)
# --------------------------------------------------------------------------
def reference_forward(x, wq_t, wk_t, wv_t, wo_t, sqk_eff, cos, sin, *,
                      num_heads, num_kv_heads, head_dim, norm_eps):
    B, T, H = x.shape
    groups = num_heads // num_kv_heads
    half = head_dim // 2
    softmax_scale = math.sqrt(head_dim)

    xf = x.astype(jnp.float32)
    q = (xf @ wq_t.astype(jnp.float32)).reshape(B, T, num_heads, head_dim)
    k = (xf @ wk_t.astype(jnp.float32)).reshape(B, T, num_kv_heads, head_dim)
    v = (xf @ wv_t.astype(jnp.float32)).reshape(B, T, num_kv_heads, head_dim)

    c = cos.astype(jnp.float32)[None, :, None, :]
    s = sin.astype(jnp.float32)[None, :, None, :]

    def rope(t):
        t1, t2 = t[..., :half], t[..., half:]
        return jnp.concatenate([t1 * c - t2 * s, t1 * s + t2 * c], axis=-1)

    q, k = rope(q), rope(k)
    q = _l2norm(q, norm_eps) * sqk_eff[0].astype(jnp.float32)
    k = _l2norm(k, norm_eps) * sqk_eff[0].astype(jnp.float32)

    k = jnp.repeat(k, groups, axis=2)
    v = jnp.repeat(v, groups, axis=2)

    scores = jnp.einsum('bqhd,bkhd->bhqk', q, k) * softmax_scale
    causal = jnp.tril(jnp.ones((T, T), dtype=bool))
    scores = jnp.where(causal[None, None], scores, -jnp.inf)
    p = jax.nn.softmax(scores, axis=-1)
    o = jnp.einsum('bhqk,bkhd->bqhd', p, v).reshape(B, T, H)
    o = o @ wo_t.astype(jnp.float32)
    return _l2norm(o, norm_eps)


if __name__ == "__main__":
    # small config consistent with the module; multiple tiles per axis so the
    # reduction, triangular-grid, diag/off-diag and GQA paths are exercised.
    batch, seq_len = 2, 32
    hidden_size, num_heads, num_kv_heads = 256, 4, 2
    head_dim = hidden_size // num_heads           # 64
    kv_dim = num_kv_heads * head_dim              # 128
    norm_eps = 1e-5
    rope_theta = 10000.0
    sqk_init_val = 1.0
    sqk_init_scale = 1.0 / math.sqrt(head_dim)
    dtype = jnp.bfloat16                          # stand-in for torch.float16

    key = jax.random.PRNGKey(0)
    kx, kq, kk, kv_, ko = jax.random.split(key, 5)

    def linear_init(k, out_f, in_f):
        bound = 1.0 / math.sqrt(in_f)             # torch nn.Linear default init
        w = jax.random.uniform(k, (out_f, in_f), jnp.float32, -bound, bound)
        return w.T.astype(dtype)                  # pass as (in, out)

    wq_t = linear_init(kq, hidden_size, hidden_size)
    wk_t = linear_init(kk, kv_dim, hidden_size)
    wv_t = linear_init(kv_, kv_dim, hidden_size)
    wo_t = linear_init(ko, hidden_size, hidden_size)
    # pre-concatenated ONCE at parameter-init time (not per forward call)
    wqkv_t = jnp.concatenate([wq_t, wk_t, wv_t], axis=1)   # (H, H + 2*kv_dim)

    # Scale module: param = ones(head_dim) * init_scale;
    # forward() = param * (init_val / init_scale)
    sqk_param = jnp.ones((head_dim,), jnp.float32) * sqk_init_scale
    sqk_eff = (sqk_param * (sqk_init_val / sqk_init_scale))[None, :]  # (1, hd)

    # RoPE tables (glue, precomputed in plain JAX)
    half = head_dim // 2
    inv_freq = 1.0 / (rope_theta ** (jnp.arange(0, half, dtype=jnp.float32) / half))
    t = jnp.arange(seq_len, dtype=jnp.float32)
    freqs = t[:, None] * inv_freq[None, :]        # (T, head_dim//2)
    cos = jnp.cos(freqs)
    sin = jnp.sin(freqs)
    # full-width lane-dense tables for the kernel's rotate-half form
    cos_full = jnp.concatenate([cos, cos], axis=-1).astype(jnp.float32)
    sin_signed = jnp.concatenate([-sin, sin], axis=-1).astype(jnp.float32)

    x = jax.random.normal(kx, (batch, seq_len, hidden_size),
                          jnp.float32).astype(dtype)

    out = attention_forward(
        x, wqkv_t, wo_t, sqk_eff, cos_full, sin_signed,
        num_heads=num_heads, num_kv_heads=num_kv_heads,
        head_dim=head_dim, norm_eps=norm_eps,
        # small tiles so multiple grid steps run at toy sizes; at real sizes
        # use block_t=256, block_k=512, block_q=128..256, block_t_out=512.
        block_t=16, block_k=128, block_q=16, block_t_out=16)
    out = jax.block_until_ready(out)

    ref = reference_forward(
        x, wq_t, wk_t, wv_t, wo_t, sqk_eff, cos, sin,
        num_heads=num_heads, num_kv_heads=num_kv_heads,
        head_dim=head_dim, norm_eps=norm_eps)

    assert out.shape == (batch, seq_len, hidden_size)
    max_err = float(jnp.max(jnp.abs(out.astype(jnp.float32) - ref)))
    assert max_err < 3e-2, f"mismatch vs reference: {max_err}"

    # TODO(synk): KV-cache (past_key_values) decode, varlen (attention_mask /
    # cu_seqlens) and window_size paths of the PyTorch forward are not
    # implemented; only the dense causal path is.
    print("KERNEL_OK")
</pallas_src>

<mosaic_0001>
module attributes {stable_mosaic.version = 11 : i64} {
  func.func @qkv_rope_norm_kernel(%arg0: i32, %arg1: i32, %arg2: i32, %arg3: memref<1x16x128xbf16, #tpu.memory_space<vmem>>, %arg4: memref<128x512xbf16, #tpu.memory_space<vmem>>, %arg5: memref<1x64xf32, #tpu.memory_space<vmem>>, %arg6: memref<16x64xf32, #tpu.memory_space<vmem>>, %arg7: memref<16x64xf32, #tpu.memory_space<vmem>>, %arg8: memref<1x4x16x64xbf16, #tpu.memory_space<vmem>>, %arg9: memref<1x2x16x64xbf16, #tpu.memory_space<vmem>>, %arg10: memref<1x2x16x64xbf16, #tpu.memory_space<vmem>>, %arg11: memref<16x512xf32, #tpu.memory_space<vmem>>) attributes {dimension_semantics = [#tpu.dimension_semantics<parallel>, #tpu.dimension_semantics<parallel>, #tpu.dimension_semantics<arbitrary>], iteration_bounds = array<i64: 2, 2, 2>, scalar_prefetch = 0 : i64, scratch_operands = 1 : i64, tpu.core_type = #tpu.core_type<tc>, window_params = [{transform_indices = @transform_0, window_bounds = array<i64: 1, 16, 128>}, {transform_indices = @transform_1, window_bounds = array<i64: 128, 512>}, {pipeline_mode = #tpu.pipeline_mode<synchronous>, transform_indices = @transform_2, window_bounds = array<i64: 1, 64>}, {transform_indices = @transform_3, window_bounds = array<i64: 16, 64>}, {transform_indices = @transform_4, window_bounds = array<i64: 16, 64>}, {transform_indices = @transform_5, window_bounds = array<i64: 1, 4, 16, 64>}, {transform_indices = @transform_6, window_bounds = array<i64: 1, 2, 16, 64>}, {transform_indices = @transform_7, window_bounds = array<i64: 1, 2, 16, 64>}]} {
    %c0_i32 = arith.constant 0 : i32
    %0 = arith.cmpi eq, %arg2, %c0_i32 : i32
    %1 = arith.extui %0 : i1 to i32
    %c0_i32_0 = arith.constant 0 : i32
    %2 = arith.cmpi ne, %1, %c0_i32_0 : i32
    scf.if %2 {
      %cst_10 = arith.constant 0.000000e+00 : f32
      %13 = vector.broadcast %cst_10 : f32 to vector<16x512xf32>
      %c0_11 = arith.constant 0 : index
      %c0_12 = arith.constant 0 : index
      %14 = vector.load %arg11[%c0_11, %c0_12] : memref<16x512xf32, #tpu.memory_space<vmem>>, vector<16x512xf32>
      tpu.vector_store %arg11[%c0_11, %c0_12], %13 {strides = array<i32>} : memref<16x512xf32, #tpu.memory_space<vmem>>, vector<16x512xf32>,
    } else {
    }
    %c0 = arith.constant 0 : index
    %c0_1 = arith.constant 0 : index
    %3 = vector.load %arg11[%c0, %c0_1] : memref<16x512xf32, #tpu.memory_space<vmem>>, vector<16x512xf32>
    %c0_2 = arith.constant 0 : index
    %c0_3 = arith.constant 0 : index
    %c0_4 = arith.constant 0 : index
    %4 = vector.load %arg3[%c0_2, %c0_3, %c0_4] : memref<1x16x128xbf16, #tpu.memory_space<vmem>>, vector<1x16x128xbf16>
    %5 = vector.shape_cast %4 : vector<1x16x128xbf16> to vector<16x128xbf16>
    %c0_5 = arith.constant 0 : index
    %c0_6 = arith.constant 0 : index
    %6 = vector.load %arg4[%c0_5, %c0_6] : memref<128x512xbf16, #tpu.memory_space<vmem>>, vector<128x512xbf16>
    %cst = arith.constant dense<0.000000e+00> : vector<16x512xf32>
    %7 = tpu.matmul %5, %6, %cst {dimension_numbers = #tpu.dot_dimension_numbers<[1], [0], [0], [1], [0, 0, 1, 1], [], []>} : vector<16x128xbf16>, vector<128x512xbf16>, vector<16x512xf32> -> vector<16x512xf32>
    %8 = arith.addf %3, %7 : vector<16x512xf32>
    %c0_7 = arith.constant 0 : index
    %c0_8 = arith.constant 0 : index
    %9 = vector.load %arg11[%c0_7, %c0_8] : memref<16x512xf32, #tpu.memory_space<vmem>>, vector<16x512xf32>
    tpu.vector_store %arg11[%c0_7, %c0_8], %8 {strides = array<i32>} : memref<16x512xf32, #tpu.memory_space<vmem>>, vector<16x512xf32>,
    %c1_i32 = arith.constant 1 : i32
    %10 = arith.cmpi eq, %arg2, %c1_i32 : i32
    %11 = arith.extui %10 : i1 to i32
    %c0_i32_9 = arith.constant 0 : i32
    %12 = arith.cmpi ne, %11, %c0_i32_9 : i32
    scf.if %12 {
      %c0_10 = arith.constant 0 : index
      %c0_11 = arith.constant 0 : index
      %13 = vector.load %arg11[%c0_10, %c0_11] : memref<16x512xf32, #tpu.memory_space<vmem>>, vector<16x512xf32>
      %c0_12 = arith.constant 0 : index
      %c0_13 = arith.constant 0 : index
      %14 = vector.load %arg6[%c0_12, %c0_13] : memref<16x64xf32, #tpu.memory_space<vmem>>, vector<16x64xf32>
      %c0_14 = arith.constant 0 : index
      %c0_15 = arith.constant 0 : index
      %15 = vector.load %arg7[%c0_14, %c0_15] : memref<16x64xf32, #tpu.memory_space<vmem>>, vector<16x64xf32>
      %16 = vector.extract_strided_slice %13 {offsets = [0, 0], sizes = [16, 256], strides = [1, 1]} : vector<16x512xf32> to vector<16x256xf32>
      %17 = vector.shape_cast %16 : vector<16x256xf32> to vector<16x4x64xf32>
      %18 = tpu.transpose %17, [1, 0, 2] : vector<16x4x64xf32> -> vector<4x16x64xf32>
      %19 = vector.extract_strided_slice %18 {offsets = [0, 0, 32], sizes = [4, 16, 32], strides = [1, 1, 1]} : vector<4x16x64xf32> to vector<4x16x32xf32>
      %20 = vector.extract_strided_slice %18 {offsets = [0, 0, 0], sizes = [4, 16, 32], strides = [1, 1, 1]} : vector<4x16x64xf32> to vector<4x16x32xf32>
      %21 = tpu.concatenate %19, %20 in 2 : vector<4x16x32xf32>, vector<4x16x32xf32> -> vector<4x16x64xf32>
      %22 = vector.shape_cast %14 : vector<16x64xf32> to vector<1x16x64xf32>
      %23 = vector.broadcast %22 : vector<1x16x64xf32> to vector<4x16x64xf32>
      %24 = arith.mulf %18, %23 : vector<4x16x64xf32>
      %25 = vector.shape_cast %15 : vector<16x64xf32> to vector<1x16x64xf32>
      %26 = vector.broadcast %25 : vector<1x16x64xf32> to vector<4x16x64xf32>
      %27 = arith.mulf %21, %26 : vector<4x16x64xf32>
      %28 = arith.addf %24, %27 : vector<4x16x64xf32>
      %29 = arith.mulf %28, %28 : vector<4x16x64xf32>
      %cst_16 = arith.constant dense<0.000000e+00> : vector<4x16xf32>
      %30 = vector.multi_reduction <add>, %29, %cst_16 [2] : vector<4x16x64xf32> to vector<4x16xf32>
      %31 = vector.shape_cast %30 : vector<4x16xf32> to vector<4x16x1xf32>
      %cst_17 = arith.constant 9.99999974E-6 : f32
      %32 = vector.broadcast %cst_17 : f32 to vector<4x16x1xf32>
      %33 = arith.addf %31, %32 : vector<4x16x1xf32>
      %34 = math.rsqrt %33 : vector<4x16x1xf32>
      %35 = vector.broadcast %34 : vector<4x16x1xf32> to vector<4x16x64xf32>
      %36 = arith.mulf %28, %35 : vector<4x16x64xf32>
      %c0_18 = arith.constant 0 : index
      %c0_19 = arith.constant 0 : index
      %37 = vector.load %arg5[%c0_18, %c0_19] : memref<1x64xf32, #tpu.memory_space<vmem>>, vector<1x64xf32>
      %cst_20 = arith.constant 8.000000e+00 : f32
      %38 = vector.broadcast %cst_20 : f32 to vector<1x64xf32>
      %39 = arith.mulf %37, %38 : vector<1x64xf32>
      %40 = vector.shape_cast %39 : vector<1x64xf32> to vector<1x1x64xf32>
      %41 = vector.broadcast %40 : vector<1x1x64xf32> to vector<4x16x64xf32>
      %42 = arith.mulf %36, %41 : vector<4x16x64xf32>
      %43 = arith.truncf %42 : vector<4x16x64xf32> to vector<4x16x64xbf16>
      %c0_21 = arith.constant 0 : index
      %c0_22 = arith.constant 0 : index
      %c0_23 = arith.constant 0 : index
      %c0_24 = arith.constant 0 : index
      %44 = vector.load %arg8[%c0_21, %c0_22, %c0_23, %c0_24] : memref<1x4x16x64xbf16, #tpu.memory_space<vmem>>, vector<1x4x16x64xbf16>
      %45 = vector.shape_cast %44 : vector<1x4x16x64xbf16> to vector<4x16x64xbf16>
      %46 = vector.shape_cast %43 : vector<4x16x64xbf16> to vector<1x4x16x64xbf16>
      tpu.vector_store %arg8[%c0_21, %c0_22, %c0_23, %c0_24], %46 {strides = array<i32>} : memref<1x4x16x64xbf16, #tpu.memory_space<vmem>>, vector<1x4x16x64xbf16>,
      %47 = vector.extract_strided_slice %13 {offsets = [0, 256], sizes = [16, 128], strides = [1, 1]} : vector<16x512xf32> to vector<16x128xf32>
      %48 = vector.shape_cast %47 : vector<16x128xf32> to vector<16x2x64xf32>
      %49 = tpu.transpose %48, [1, 0, 2] : vector<16x2x64xf32> -> vector<2x16x64xf32>
      %50 = vector.extract_strided_slice %49 {offsets = [0, 0, 32], sizes = [2, 16, 32], strides = [1, 1, 1]} : vector<2x16x64xf32> to vector<2x16x32xf32>
      %51 = vector.extract_strided_slice %49 {offsets = [0, 0, 0], sizes = [2, 16, 32], strides = [1, 1, 1]} : vector<2x16x64xf32> to vector<2x16x32xf32>
      %52 = tpu.concatenate %50, %51 in 2 : vector<2x16x32xf32>, vector<2x16x32xf32> -> vector<2x16x64xf32>
      %53 = vector.shape_cast %14 : vector<16x64xf32> to vector<1x16x64xf32>
      %54 = vector.broadcast %53 : vector<1x16x64xf32> to vector<2x16x64xf32>
      %55 = arith.mulf %49, %54 : vector<2x16x64xf32>
      %56 = vector.shape_cast %15 : vector<16x64xf32> to vector<1x16x64xf32>
      %57 = vector.broadcast %56 : vector<1x16x64xf32> to vector<2x16x64xf32>
      %58 = arith.mulf %52, %57 : vector<2x16x64xf32>
      %59 = arith.addf %55, %58 : vector<2x16x64xf32>
      %60 = arith.mulf %59, %59 : vector<2x16x64xf32>
      %cst_25 = arith.constant dense<0.000000e+00> : vector<2x16xf32>
      %61 = vector.multi_reduction <add>, %60, %cst_25 [2] : vector<2x16x64xf32> to vector<2x16xf32>
      %62 = vector.shape_cast %61 : vector<2x16xf32> to vector<2x16x1xf32>
      %cst_26 = arith.constant 9.99999974E-6 : f32
      %63 = vector.broadcast %cst_26 : f32 to vector<2x16x1xf32>
      %64 = arith.addf %62, %63 : vector<2x16x1xf32>
      %65 = math.rsqrt %64 : vector<2x16x1xf32>
      %66 = vector.broadcast %65 : vector<2x16x1xf32> to vector<2x16x64xf32>
      %67 = arith.mulf %59, %66 : vector<2x16x64xf32>
      %c0_27 = arith.constant 0 : index
      %c0_28 = arith.constant 0 : index
      %68 = vector.load %arg5[%c0_27, %c0_28] : memref<1x64xf32, #tpu.memory_space<vmem>>, vector<1x64xf32>
      %cst_29 = arith.constant 1.000000e+00 : f32
      %69 = vector.broadcast %cst_29 : f32 to vector<1x64xf32>
      %70 = arith.mulf %68, %69 : vector<1x64xf32>
      %71 = vector.shape_cast %70 : vector<1x64xf32> to vector<1x1x64xf32>
      %72 = vector.broadcast %71 : vector<1x1x64xf32> to vector<2x16x64xf32>
      %73 = arith.mulf %67, %72 : vector<2x16x64xf32>
      %74 = arith.truncf %73 : vector<2x16x64xf32> to vector<2x16x64xbf16>
      %c0_30 = arith.constant 0 : index
      %c0_31 = arith.constant 0 : index
      %c0_32 = arith.constant 0 : index
      %c0_33 = arith.constant 0 : index
      %75 = vector.load %arg9[%c0_30, %c0_31, %c0_32, %c0_33] : memref<1x2x16x64xbf16, #tpu.memory_space<vmem>>, vector<1x2x16x64xbf16>
      %76 = vector.shape_cast %75 : vector<1x2x16x64xbf16> to vector<2x16x64xbf16>
      %77 = vector.shape_cast %74 : vector<2x16x64xbf16> to vector<1x2x16x64xbf16>
      tpu.vector_store %arg9[%c0_30, %c0_31, %c0_32, %c0_33], %77 {strides = array<i32>} : memref<1x2x16x64xbf16, #tpu.memory_space<vmem>>, vector<1x2x16x64xbf16>,
      %78 = vector.extract_strided_slice %13 {offsets = [0, 384], sizes = [16, 128], strides = [1, 1]} : vector<16x512xf32> to vector<16x128xf32>
      %79 = vector.shape_cast %78 : vector<16x128xf32> to vector<16x2x64xf32>
      %80 = tpu.transpose %79, [1, 0, 2] : vector<16x2x64xf32> -> vector<2x16x64xf32>
      %81 = arith.truncf %80 : vector<2x16x64xf32> to vector<2x16x64xbf16>
      %c0_34 = arith.constant 0 : index
      %c0_35 = arith.constant 0 : index
      %c0_36 = arith.constant 0 : index
      %c0_37 = arith.constant 0 : index
      %82 = vector.load %arg10[%c0_34, %c0_35, %c0_36, %c0_37] : memref<1x2x16x64xbf16, #tpu.memory_space<vmem>>, vector<1x2x16x64xbf16>
      %83 = vector.shape_cast %82 : vector<1x2x16x64xbf16> to vector<2x16x64xbf16>
      %84 = vector.shape_cast %81 : vector<2x16x64xbf16> to vector<1x2x16x64xbf16>
      tpu.vector_store %arg10[%c0_34, %c0_35, %c0_36, %c0_37], %84 {strides = array<i32>} : memref<1x2x16x64xbf16, #tpu.memory_space<vmem>>, vector<1x2x16x64xbf16>,
    } else {
    }
    return
  }
  func.func @transform_0(%arg0: i32, %arg1: i32, %arg2: i32) -> (i32, i32, i32) {
    %c0_i32 = arith.constant 0 : i32
    return %arg0, %arg1, %arg2 : i32, i32, i32
  }
  func.func @transform_1(%arg0: i32, %arg1: i32, %arg2: i32) -> (i32, i32) {
    %c0_i32 = arith.constant 0 : i32
    %c0_i32_0 = arith.constant 0 : i32
    return %arg2, %c0_i32 : i32, i32
  }
  func.func @transform_2(%arg0: i32, %arg1: i32, %arg2: i32) -> (i32, i32) {
    %c0_i32 = arith.constant 0 : i32
    %c0_i32_0 = arith.constant 0 : i32
    %c0_i32_1 = arith.constant 0 : i32
    return %c0_i32, %c0_i32_0 : i32, i32
  }
  func.func @transform_3(%arg0: i32, %arg1: i32, %arg2: i32) -> (i32, i32) {
    %c0_i32 = arith.constant 0 : i32
    %c0_i32_0 = arith.constant 0 : i32
    return %arg1, %c0_i32 : i32, i32
  }
  func.func @transform_4(%arg0: i32, %arg1: i32, %arg2: i32) -> (i32, i32) {
    %c0_i32 = arith.constant 0 : i32
    %c0_i32_0 = arith.constant 0 : i32
    return %arg1, %c0_i32 : i32, i32
  }
  func.func @transform_5(%arg0: i32, %arg1: i32, %arg2: i32) -> (i32, i32, i32, i32) {
    %c0_i32 = arith.constant 0 : i32
    %c0_i32_0 = arith.constant 0 : i32
    %c0_i32_1 = arith.constant 0 : i32
    return %arg0, %c0_i32, %arg1, %c0_i32_0 : i32, i32, i32, i32
  }
  func.func @transform_6(%arg0: i32, %arg1: i32, %arg2: i32) -> (i32, i32, i32, i32) {
    %c0_i32 = arith.constant 0 : i32
    %c0_i32_0 = arith.constant 0 : i32
    %c0_i32_1 = arith.constant 0 : i32
    return %arg0, %c0_i32, %arg1, %c0_i32_0 : i32, i32, i32, i32
  }
  func.func @transform_7(%arg0: i32, %arg1: i32, %arg2: i32) -> (i32, i32, i32, i32) {
    %c0_i32 = arith.constant 0 : i32
    %c0_i32_0 = arith.constant 0 : i32
    %c0_i32_1 = arith.constant 0 : i32
    return %arg0, %c0_i32, %arg1, %c0_i32_0 : i32, i32, i32, i32
  }
}

</mosaic_0001>

<bundles_post_ra>
// kernel: tpu_custom_call.1
= control target key start
LH: loop header
LB: loop body
LE: loop exit
PB: predicated region body
PF: predicated region fallthrough
CT: control target
= control target key end

     0   :  { %s4096_s0 = inlined_call_operand.hbm [shape: bf16[2,32,256], index: 0, kind: input, shape index: {}]   ;;  %s4097_s1 = inlined_call_operand.hbm [shape: bf16[256,512], index: 1, kind: input, shape index: {}]   ;;  %s4098_s2 = inlined_call_operand.vmem [shape: f32[1,64], index: 2, kind: input, shape index: {}]   ;;  %s4099_s3 = inlined_call_operand.hbm [shape: f32[32,64], index: 3, kind: input, shape index: {}]   ;;  %s4100_s4 = inlined_call_operand.hbm [shape: f32[32,64], index: 4, kind: input, shape index: {}]   ;;  %s4101_s5 = inlined_call_operand.hbm [shape: bf16[2,4,32,64], index: 5, kind: output, shape index: {0}]   ;;  %s4102_s6 = inlined_call_operand.hbm [shape: bf16[2,2,32,64], index: 6, kind: output, shape index: {1}]   ;;  %s4103_s7 = inlined_call_operand.hbm [shape: bf16[2,2,32,64], index: 7, kind: output, shape index: {2}]  }
   0x1   :  { %4135 = sst [smem:[#allocation45_spill]] %s4096_s0 }
   0x2   :  { %4136 = sst [smem:[#allocation46_spill]] %s4097_s1 }
   0x3   :  { %4137 = sst [smem:[#allocation47_spill]] %s4098_s2 }
   0x4   :  { %4138 = sst [smem:[#allocation48_spill]] %s4099_s3 }
   0x5   :  { %4139 = sst [smem:[#allocation49_spill]] %s4100_s4 }
   0x6   :  { %4140 = sst [smem:[#allocation50_spill]] %s4101_s5 }
   0x7   :  { %4141 = sst [smem:[#allocation51_spill]] %s4102_s6 }
   0x8   :  { %4142 = sst [smem:[#allocation52_spill]] %s4103_s7 }
   0x9   :  { %13 = vsyncpa [#allocation4], 0 }
   0xa   :  { %15 = vsyncpa [#allocation4 + $0x1], 0 }
   0xb   :  { %16 = vsyncpa [#allocation7], 0 }
   0xc   :  { %18 = vsyncpa [#allocation7 + $0x1], 0 }
   0xd   :  { %19 = vsyncpa [#allocation10], 0 }
   0xe   :  { %21 = vsyncpa [#allocation10 + $0x1], 0 }
   0xf   :  { %22 = vsyncpa [#allocation5], 0 }
  0x10   :  { %24 = vsyncpa [#allocation5 + $0x1], 0 }
  0x11   :  { %25 = vsyncpa [#allocation13], 0 }
  0x12   :  { %27 = vsyncpa [#allocation13 + $0x1], 0  ;;  %s3115_s24 = smov 0   ;;  %s3117_s25 = smov 0  }
  0x13   :  { %s3119_s26 = smov 0   ;;  %s3121_s27 = smov 0  }
  0x14   :  { %s3123_s28 = smov 0   ;;  %s3125_s29 = smov 0  }
  0x15   :  { %s3127_s30 = smov 0   ;;  %s3129_s8 = smov 0  }
  0x16   :  { %s3131_s9 = smov 0   ;;  %s3133_s10 = smov 0  }
  0x17   :  { %s3135_s11 = smov 0   ;;  %s3137_s12 = smov 0  }
  0x18   :  { %s3139_s13 = smov 0   ;;  %s3141_s14 = smov 0  }
  0x19   :  { %s3143_s15 = smov 0   ;;  %s3145_s16 = smov 0  }
  0x1a   :  { %s3147_s17 = smov 0   ;;  %s3149_s18 = smov 0  }
  0x1b   :  { %s3151_s19 = smov 0  }
  0x1c LB: > { %4143 = sst [smem:[#allocation27_spill]] %s2962_s24  ;;  %s3209_s20 = sadd.s32 4294967295, %s3034_s19   ;;  %s3034_s19 = sphi %s3151_s19, %s33_s19   ;;  %s3030_s18 = sphi %s3149_s18, %s4230_s18   ;;  %s3026_s17 = sphi %s3147_s17, %s4229_s17   ;;  %s3022_s16 = sphi %s3145_s16, %s4228_s16   ;;  %s3018_s15 = sphi %s3143_s15, %s4227_s15   ;;  %s3014_s14 = sphi %s3141_s14, %s4226_s14   ;;  %s3010_s13 = sphi %s3139_s13, %s4225_s13   ;;  %s3006_s12 = sphi %s3137_s12, %s4224_s12   ;;  %s3002_s11 = sphi %s3135_s11, %s4223_s11   ;;  %s2998_s10 = sphi %s3133_s10, %s4214_s10   ;;  %s2994_s9 = sphi %s3131_s9, %s4213_s9   ;;  %s2990_s8 = sphi %s3129_s8, %s4212_s8   ;;  %s2986_s30 = sphi %s3127_s30, %s4211_s30   ;;  %s2982_s29 = sphi %s3125_s29, %s4222_s29   ;;  %s2978_s28 = sphi %s3123_s28, %s4221_s28   ;;  %s2974_s27 = sphi %s3121_s27, %s4220_s27   ;;  %s2970_s26 = sphi %s3119_s26, %s4219_s26   ;;  %s2966_s25 = sphi %s3117_s25, %s4217_s25   ;;  %s2962_s24 = sphi %s3115_s24, %s4210_s24  }
  0x1d   : > { %4144 = sst [smem:[#allocation28_spill]] %s2966_s25  ;;  %s45_s22 = sadd.s32 1, %s3022_s16 }
  0x1e   : > { %4145 = sst [smem:[#allocation29_spill]] %s2990_s8  ;;  %p4115_p0 = scmp.eq.s32.totalorder %s3034_s19, 0 }
  0x1f   : > { %4146 = sst [smem:[#allocation30_spill]] %s2994_s9  ;;  %p3214_p1 = scmp.ge.s32.totalorder %s45_s22, 2 }
  0x20   : > { %4147 = sst [smem:[#allocation31_spill]] %s3002_s11  ;;  %p4114_p2 = scmp.eq.s32.totalorder %s3209_s20, 0 }
  0x21   : > { %4148 = sst [smem:[#allocation32_spill]] %s3010_s13  ;;  %s89_s7 = sadd.s32 1, %s2994_s9 }
  0x22   : > { %4149 = sst [smem:[#allocation33_spill]] %s3014_s14  ;;  %p96_p3 = scmp.ne.s32.totalorder %s2994_s9, %s2990_s8 }
  0x23   : > { %4150 = sst [smem:[#allocation34_spill]] %s3018_s15  ;;  %s4232_s22 = smov (%p3214_p1, %s45_s22), 0 }
  0x24   : > { %4152 = sst [smem:[#allocation35_spill]] %s4232_s22  ;;  %p3228_p4 = por %p96_p3, %p4115_p0 }
  0x25   : > { %p102_p5 = scmp.ne.s32.totalorder %s2990_s8, %s2986_s30  ;;  %s3235_s6 = ssub.s32 %s3022_s16, %s4232_s22 }
  0x26   : > { %p200_p6 = scmp.ne.s32.totalorder %s2970_s26, %s2966_s25  ;;  %p87_p7 = scmp.eq.s32.totalorder %s3235_s6, 0 }
  0x27   : > { %p3242_p8 = por %p102_p5, %p4114_p2  ;;  %p201_p9 = scmp.eq.s32.totalorder %s3209_s20, 7 }
  0x28   : > { %p206_p10 = scmp.ne.s32.totalorder %s2966_s25, %s2962_s24  ;;  %s4159_s30 = sadd.s32 4294967294, %s3034_s19  }
  0x29   : > { %s4154_s5 = scalar_select %p3242_p8, 1, 0 }
  0x2a   : > { %s3250_s15 = scalar_select %p87_p7, %s2994_s9, %s89_s7  }
  0x2b   : > { %4155 = sst [smem:[#allocation36_spill]] %s4154_s5  ;;  %p3252_p11 = por %p201_p9, %p200_p6 }
  0x2c   : > { %4156 = sst [smem:[#allocation37_spill]] %s3250_s15  ;;  %p207_p12 = scmp.eq.s32.totalorder %s4159_s30, 7 }
  0x2d   : > { %s4157_s14 = scalar_select %p3252_p11, 1, 0 }
  0x2e   : > { %p4113_p13 = scmp.lt.s32.totalorder %s3034_s19, 8  ;;  %p3259_p3 = por %p207_p12, %p206_p10 }
  0x2f   : > { %4158 = sst [smem:[#allocation38_spill]] %s4157_s14  ;;  %s311_s2 = sand.u32 1, %s3034_s19  }
  0x30   : > { %s4160_s22 = scalar_select %p3259_p3, 1, 0 }
  0x31   : > { %s313_s13 = sand.u32 1, %s2994_s9   ;;  %s2400_s4 = sshll.u32 %s3022_s16, 12 }
  0x32   : > { %4161 = sst [smem:[#allocation39_spill]] %s4160_s22  ;;  %s2298_s8 = sshll.u32 %s313_s13, 8 }
  0x33   : > { %s4162_s1 = sld [smem:[#allocation46_spill]]  ;;  %s315_s15 = scalar_lea.vmem [#allocation6], %s2298_s8 }
  0x34   : > { %s323_s30 = sshll.u32 %s315_s15, 4  ;;  %p3275_p5 = pnand %p4113_p13, %p3228_p4  ;;  %s3279_s30 = int_to_ptr.vmem [resolvable:$true] %s323_s30 }
  0x35   : > { %s3281_s13 = scalar_lea.sflag [#allocation7], %s311_s2 }
  0x36   : > { %4164 = sst [smem:[#allocation40_spill]] %s3281_s13  ;;  %p2742_p7 = pneg %p3275_p5 }
  0x39   : > { %s3269_s7 = scalar_lea.hbm %s4162_s1, %s2400_s4  ;;  %s2745_s8 = scalar_lea.hbm %s4162_s1, 8192 }
  0x3a   : > { %s2740_s3 = scalar_lea.hbm %s3269_s7, 4096  ;;  %p2746_p4 = scmp.lt.u32.totalorder %s3269_s7, %s4162_s1 }
  0x3b   : > { %p2741_p6 = scmp.ne.s32.totalorder %s3269_s7, %s2740_s3  ;;  %p2747_p12 = scmp.lt.u32.totalorder %s2745_s8, %s2740_s3 }
  0x3c   : > { %p2749_p2 = scmp.lt.u32.totalorder %s2740_s3, %s3269_s7 }
  0x3d   : > { %p2743_p9 = pnand %p2742_p7, %p2741_p6  ;;  %p2748_p13 = por %p2747_p12, %p2746_p4 }
  0x3f   : > { %p2744_p10 = pneg %p2743_p9  ;;  %p2750_p0 = por %p2749_p2, %p2748_p13 }
  0x41   : > { %p2751_p3 = pnand %p2750_p0, %p2744_p10 }
  0x43   : > { %2754 = shalt.err (!%p2751_p3)
}
  0x44   : > { %s2755_s2 = scalar_lea.vmem %s3279_s30, 4096  ;;  %s3036_s4 = smov [#allocation6]  }
  0x45   : > { %p2756_p6 = scmp.ne.s32.totalorder %s3279_s30, %s2755_s2  ;;  %s2760_s5 = sshll.u32 %s3036_s4, 4  ;;  %s2761_s5 = int_to_ptr.vmem [resolvable:$false] %s2760_s5 }
  0x46   : > { %s2762_s15 = scalar_lea.vmem %s2761_s5, 8192  ;;  %p2763_p8 = scmp.lt.s32.totalorder %s3279_s30, %s2761_s5 }
  0x47   : > { %p2758_p9 = pnand %p2756_p6, %p2742_p7  ;;  %p2764_p4 = scmp.lt.s32.totalorder %s2762_s15, %s2755_s2 }
  0x49   : > { %p2759_p11 = pneg %p2758_p9  ;;  %p2765_p12 = por %p2764_p4, %p2763_p8 }
  0x4b   : > { %p2766_p2 = pnand %p2765_p12, %p2759_p11 }
  0x4d   : > { %2769 = shalt.err (!%p2766_p2)
}
  0x4e   : > { %s3037_s3 = smov 256   ;;  %s3038_s8 = smov 16  }
  0x4f   : > { %2457 = dma.hbm_to_vmem [thread:$0]  (!%p3275_p5), %s3269_s7, 4096, %s3279_s30, %s3281_s13, %s3037_s3, %s3037_s3, %s3038_s8  }
  0x50   : > { %p2308_p0 = scmp.ge.s32.totalorder %s3034_s19, 1  ;;  %p373_p8 = scmp.lt.s32.totalorder %s3034_s19, 9 }
  0x51   : > { %s48_s2 = sadd.s32 1, %s3026_s17  ;;  %s52_s4 = sadd.s32 1, %s3030_s18 }
  0x52   : > { %p3311_p11 = pnand %p2308_p0, %p373_p8  ;;  %s4234_s2 = smov (!%p3214_p1, %s48_s2), %s3026_s17 }
  0x53   : > { %s63_s5 = sadd.s32 1, %s3006_s12  ;;  %p50_p13 = scmp.ge.s32.totalorder %s4234_s2, 2 }
  0x54   : > { %s4165_s21 = scalar_select %p3311_p11, 1, 0 }
  0x55   : > { %p70_p3 = scmp.ne.s32.totalorder %s3006_s12, %s3002_s11  ;;  %p76_p7 = scmp.ne.s32.totalorder %s3002_s11, %s2998_s10 }
  0x56   : > { %4166 = sst [smem:[#allocation41_spill]] %s4165_s21  ;;  %s190_s24 = sadd.s32 1, %s2970_s26 }
  0x57   : > { %s4236_s2 = smov (%p50_p13, %s4234_s2), 0  ;;  %s4238_s4 = smov (!%p50_p13, %s52_s4), %s3030_s18 }
  0x58   : > { %4167 = sst [smem:[#allocation42_spill]] %s4236_s2  ;;  %s3331_s7 = ssub.s32 %s3026_s17, %s4236_s2 }
  0x59   : > { %p4168_p5 = scmp.eq.s32.totalorder %s3034_s19, 0  ;;  %p54_p10 = scmp.ge.s32.totalorder %s4238_s4, 2 }
  0x5a   : > { %p4170_p6 = scmp.eq.s32.totalorder %s3209_s20, 0  ;;  %s286_s30 = sand.u32 1, %s3006_s12  }
  0x5b   : > { %p3335_p1 = por %p4168_p5, %p70_p3  ;;  %s4240_s4 = smov (%p54_p10, %s4238_s4), 0 }
  0x5c   : > { %p3341_p9 = por %p4170_p6, %p76_p7  ;;  %4173 = sst [smem:[#allocation44_spill]] %s4240_s4 }
  0x5d   : > { %s2293_s15 = sshll.u32 %s286_s30, 3  ;;  %s56_s3 = ssub.s32 %s3030_s18, %s4240_s4 }
  0x5e   : > { %s4171_s10 = scalar_select %p3341_p9, 1, 0 }
  0x5f   : > { %s58_s8 = sor.u32 %s3331_s7, %s56_s3  ;;  %s2398_s1 = sshll.u32 %s3026_s17, 2 }
  0x60   : > { %4172 = sst [smem:[#allocation43_spill]] %s4171_s10  ;;  %s60_s2 = sor.u32 %s3235_s6, %s58_s8 }
  0x61   : > { %p188_p12 = scmp.eq.s32.totalorder %s58_s8, 0  ;;  %p61_p2 = scmp.eq.s32.totalorder %s60_s2, 0 }
  0x62   : > { %s296_s9 = sadd.s32 %s3022_s16, %s2398_s1  ;;  %s2296_s25 = sshll.u32 %s3030_s18, 3 }
  0x63   : > { %s3356_s22 = scalar_select %p188_p12, %s2970_s26, %s190_s24  }
  0x64   : > { %s3359_s14 = scalar_select %p61_p2, %s3006_s12, %s63_s5  }
  0x65   : > { %s290_s10 = scalar_lea.vmem [#allocation3], %s2293_s15  ;;  %s298_s21 = sadd.s32 %s2296_s25, %s296_s9 }
  0x66   : > { %s301_s11 = sshll.u32 %s290_s10, 4  ;;  %s2297_s13 = sshll.u32 %s298_s21, 6  ;;  %s3362_s11 = int_to_ptr.vmem [resolvable:$true] %s301_s11 }
  0x67   : > { %p4174_p0 = scmp.lt.s32.totalorder %s3034_s19, 8  ;;  %s4176_s0 = sld [smem:[#allocation45_spill]] }
  0x68   : > { %s3377_s25 = scalar_lea.sflag [#allocation4], %s286_s30 }
  0x69   : > { %p3368_p8 = pnand %p4174_p0, %p3335_p1 }
  0x6b   : > { %p2772_p3 = pneg %p3368_p8 }
  0x6d   : > { %s3375_s1 = scalar_lea.hbm %s4176_s0, %s2297_s13  ;;  %s2775_s24 = scalar_lea.hbm %s4176_s0, 1024 }
  0x6e   : > { %s2770_s9 = scalar_lea.hbm %s3375_s1, 128  ;;  %p2776_p1 = scmp.lt.u32.totalorder %s3375_s1, %s4176_s0 }
  0x6f   : > { %p2771_p13 = scmp.ne.s32.totalorder %s3375_s1, %s2770_s9  ;;  %p2777_p10 = scmp.lt.u32.totalorder %s2775_s24, %s2770_s9 }
  0x70   : > { %p2779_p12 = scmp.lt.u32.totalorder %s2770_s9, %s3375_s1 }
  0x71   : > { %p2773_p7 = pnand %p2772_p3, %p2771_p13  ;;  %p2778_p6 = por %p2777_p10, %p2776_p1 }
  0x73   : > { %p2774_p5 = pneg %p2773_p7  ;;  %p2780_p2 = por %p2779_p12, %p2778_p6 }
  0x75   : > { %p2781_p0 = pnand %p2780_p2, %p2774_p5 }
  0x77   : > { %2784 = shalt.err (!%p2781_p0)
}
  0x78   : > { %s2785_s10 = scalar_lea.vmem %s3362_s11, 128  ;;  %s3039_s30 = smov [#allocation3]  }
  0x79   : > { %p2786_p13 = scmp.ne.s32.totalorder %s3362_s11, %s2785_s10  ;;  %s2790_s15 = sshll.u32 %s3039_s30, 4  ;;  %s2791_s15 = int_to_ptr.vmem [resolvable:$false] %s2790_s15 }
  0x7a   : > { %s2792_s8 = scalar_lea.vmem %s2791_s15, 256  ;;  %p2793_p9 = scmp.lt.s32.totalorder %s3362_s11, %s2791_s15 }
  0x7b   : > { %p2788_p7 = pnand %p2786_p13, %p2772_p3  ;;  %p2794_p1 = scmp.lt.s32.totalorder %s2792_s8, %s2785_s10 }
  0x7d   : > { %p2789_p4 = pneg %p2788_p7  ;;  %p2795_p10 = por %p2794_p1, %p2793_p9 }
  0x7f   : > { %p2796_p6 = pnand %p2795_p10, %p2789_p4 }
  0x81   : > { %2799 = shalt.err (!%p2796_p6)
}
  0x82   : > { %s3040_s6 = smov 128   ;;  %s3041_s2 = smov 64  }
  0x83   : > { %s3042_s9 = smov 4   ;;  %s136_s21 = sadd.s32 1, %s2982_s29 }
  0x84   : > { %2454 = dma.hbm_to_vmem [thread:$0]  (!%p3368_p8), %s3375_s1, 128, %s3362_s11, %s3377_s25, %s3040_s6, %s3041_s2, %s3042_s9  }
  0x85   : > { %p4177_p9 = scmp.eq.s32.totalorder %s3331_s7, 0  ;;  %p143_p4 = scmp.ne.s32.totalorder %s2982_s29, %s2978_s28 }
  0x86   : > { %p149_p3 = scmp.ne.s32.totalorder %s2978_s28, %s2974_s27  ;;  %s335_s24 = sand.u32 1, %s2982_s29  }
  0x87   : > { %s3410_s5 = scalar_select %p4177_p9, %s2982_s29, %s136_s21  }
  0x88   : > { %s2401_s13 = sshll.u32 %s3026_s17, 8  ;;  %p4178_p5 = scmp.eq.s32.totalorder %s3034_s19, 0 }
  0x89   : > { %p4179_p2 = scmp.eq.s32.totalorder %s3209_s20, 0  ;;  %s3428_s10 = sshll.u32 %s335_s24, 4 }
  0x8a   : > { %p145_p12 = por %p143_p4, %p4178_p5  ;;  %s4181_s7 = sld [smem:[#allocation48_spill]] }
  0x8b   : > { %p3422_p0 = por %p149_p3, %p4179_p2  ;;  %p4182_p8 = scmp.lt.s32.totalorder %s3034_s19, 8 }
  0x8c   : > { %s337_s25 = scalar_lea.vmem [#allocation8], %s3428_s10 }
  0x8d   : > { %s4180_s23 = scalar_select %p3422_p0, 1, 0 }
  0x8e   : > { %p3439_p13 = pnand %p4182_p8, %p145_p12  ;;  %s344_s30 = sshll.u32 %s337_s25, 4  ;;  %s3444_s30 = int_to_ptr.vmem [resolvable:$true] %s344_s30 }
  0x90   : > { %s3435_s1 = scalar_lea.hbm %s4181_s7, %s2401_s13  ;;  %p2802_p1 = pneg %p3439_p13 }
  0x91   : > { %s2800_s15 = scalar_lea.hbm %s3435_s1, 256  ;;  %s2805_s9 = scalar_lea.hbm %s4181_s7, 512 }
  0x92   : > { %p2801_p7 = scmp.ne.s32.totalorder %s3435_s1, %s2800_s15  ;;  %p2806_p9 = scmp.lt.u32.totalorder %s3435_s1, %s4181_s7 }
  0x93   : > { %p2807_p4 = scmp.lt.u32.totalorder %s2805_s9, %s2800_s15  ;;  %p2809_p5 = scmp.lt.u32.totalorder %s2800_s15, %s3435_s1 }
  0x94   : > { %p2803_p10 = pnand %p2802_p1, %p2801_p7 }
  0x95   : > { %p2808_p3 = por %p2807_p4, %p2806_p9 }
  0x96   : > { %p2804_p6 = pneg %p2803_p10 }
  0x97   : > { %p2810_p12 = por %p2809_p5, %p2808_p3 }
  0x99   : > { %p2811_p2 = pnand %p2810_p12, %p2804_p6 }
  0x9b   : > { %2814 = shalt.err (!%p2811_p2)
}
  0x9c   : > { %s2815_s3 = scalar_lea.vmem %s3444_s30, 256  ;;  %s3043_s25 = smov [#allocation8]  }
  0x9d   : > { %p2816_p8 = scmp.ne.s32.totalorder %s3444_s30, %s2815_s3  ;;  %s2820_s8 = sshll.u32 %s3043_s25, 4  ;;  %s2821_s8 = int_to_ptr.vmem [resolvable:$false] %s2820_s8 }
  0x9e   : > { %s2822_s2 = scalar_lea.vmem %s2821_s8, 512  ;;  %p2823_p0 = scmp.lt.s32.totalorder %s3444_s30, %s2821_s8 }
  0x9f   : > { %p2818_p7 = pnand %p2816_p8, %p2802_p1  ;;  %p2824_p9 = scmp.lt.s32.totalorder %s2822_s2, %s2815_s3 }
  0xa1   : > { %p2819_p10 = pneg %p2818_p7  ;;  %p2825_p4 = por %p2824_p9, %p2823_p0 }
  0xa3   : > { %p2826_p3 = pnand %p2825_p4, %p2819_p10 }
  0xa5   : > { %2829 = shalt.err (!%p2826_p3)
}
  0xa6   : > { %s3044_s15 = smov 8   ;;  %s4184_s9 = sld [smem:[#allocation40_spill]] }
  0xa7   : > { %s4185_s3 = sld [smem:[#allocation49_spill]]  ;;  %s358_s8 = scalar_lea.vmem [#allocation9], %s3428_s10 }
  0xa8   : > { %s365_s2 = sshll.u32 %s358_s8, 4  ;;  %s3487_s0 = scalar_lea.sflag [#allocation10], %s335_s24  ;;  %s3483_s2 = int_to_ptr.vmem [resolvable:$true] %s365_s2 }
  0xac   : > { %2460 = dma.hbm_to_vmem [thread:$0]  (!%p3439_p13), %s3435_s1, 256, %s3444_s30, %s4184_s9, %s3040_s6, %s3040_s6, %s3044_s15  }
  0xad   : > { %s3480_s25 = scalar_lea.hbm %s4185_s3, %s2401_s13  ;;  %s2835_s30 = scalar_lea.hbm %s4185_s3, 512 }
  0xae   : > { %s2830_s7 = scalar_lea.hbm %s3480_s25, 256  ;;  %p2836_p12 = scmp.lt.u32.totalorder %s3480_s25, %s4185_s3 }
  0xaf   : > { %p2831_p0 = scmp.ne.s32.totalorder %s3480_s25, %s2830_s7  ;;  %p2837_p2 = scmp.lt.u32.totalorder %s2835_s30, %s2830_s7 }
  0xb0   : > { %p2839_p7 = scmp.lt.u32.totalorder %s2830_s7, %s3480_s25 }
  0xb1   : > { %p2833_p6 = pnand %p2831_p0, %p2802_p1  ;;  %p2838_p8 = por %p2837_p2, %p2836_p12 }
  0xb3   : > { %p2834_p5 = pneg %p2833_p6  ;;  %p2840_p10 = por %p2839_p7, %p2838_p8 }
  0xb5   : > { %p2841_p9 = pnand %p2840_p10, %p2834_p5 }
  0xb7   : > { %2844 = shalt.err (!%p2841_p9)
}
  0xb8   : > { %s2845_s24 = scalar_lea.vmem %s3483_s2, 256  ;;  %s3045_s10 = smov [#allocation9]  }
  0xb9   : > { %p2846_p4 = scmp.ne.s32.totalorder %s3483_s2, %s2845_s24  ;;  %s2850_s11 = sshll.u32 %s3045_s10, 4  ;;  %s2851_s11 = int_to_ptr.vmem [resolvable:$false] %s2850_s11 }
  0xba   : > { %s2852_s8 = scalar_lea.vmem %s2851_s11, 512  ;;  %p2853_p6 = scmp.lt.s32.totalorder %s3483_s2, %s2851_s11 }
  0xbb   : > { %p2848_p3 = pnand %p2846_p4, %p2802_p1  ;;  %p2854_p12 = scmp.lt.s32.totalorder %s2852_s8, %s2845_s24 }
  0xbd   : > { %p2849_p0 = pneg %p2848_p3  ;;  %p2855_p2 = por %p2854_p12, %p2853_p6 }
  0xbf   : > { %p2856_p8 = pnand %p2855_p2, %p2849_p0 }
  0xc1   : > { %2859 = shalt.err (!%p2856_p8)
}
  0xc2   : > { %2463 = dma.hbm_to_vmem [thread:$0]  (!%p3439_p13), %s3480_s25, 256, %s3483_s2, %s3487_s0, %s3040_s6, %s3040_s6, %s3044_s15  }
  0xc3   : > { %377 = sbr.rel (%p3311_p11) target bundleno = 1006 (0x3ee), region = 40  ;;  %s4187_s1 = sld [smem:[#allocation31_spill]] (!%p3311_p11) }
  0xc4   : > { %s4188_s13 = sld [smem:[#allocation43_spill]] (!%p3311_p11) }
  0xc9   : > { %s379_s30 = sand.u32 (!%p3311_p11), 1, %s4187_s1  }
  0xca   : > { %s3519_s9 = sshll.u32 %s379_s30, 3  ;;  %s380_s21 = scalar_lea.sflag [#allocation4], %s379_s30 }
  0xcb   : > { %s383_s24 = scalar_lea.vmem [#allocation3], %s3519_s9  ;;  %p4189_p1 = scmp.ne.s32.totalorder %s4188_s13, 0 }
  0xcd   : > { %2937 = dma.done.wait (%p4189_p1), %s380_s21, 128  }
  0xce   : > { %2939 = vsyncadd (%p4189_p1), %s380_s21, 4294967168  ;;  %s4190_s27 = sld [smem:[#allocation29_spill]]  ;;  %s4191_s0 = sld [smem:[#allocation36_spill]] }
  0xcf   : > { %s388_s6 = sand.u32 1, %s3209_s20  }
  0xd0   : > { %s389_s2 = scalar_lea.sflag [#allocation7], %s388_s6 }
  0xd4   : > { %s390_s15 = sand.u32 1, %s4190_s27   ;;  %p4192_p11 = scmp.ne.s32.totalorder %s4191_s0, 0 }
  0xd5   : > { %s2310_s25 = sshll.u32 %s390_s15, 8 }
  0xd6   : > { %s3530_s10 = scalar_lea.vmem [#allocation6], %s2310_s25 }
  0xd7   : > { %2941 = dma.done.wait (%p4192_p11), %s389_s2, 4096  }
  0xd8   : > { %2943 = vsyncadd (%p4192_p11), %s389_s2, 4294963200  ;;  %s399_s11 = sand.u32 1, %s2978_s28   ;;  %p4193_p13 = scmp.ne.s32.totalorder %s4180_s23, 0 }
  0xd9   : > { %s3537_s8 = sshll.u32 %s399_s11, 4 }
  0xda   : > { %s401_s7 = scalar_lea.vmem [#allocation8], %s3537_s8 }
  0xdb   : > { %2945 = dma.done.wait (%p4193_p13), %s389_s2, 256  }
  0xdc   : > { %2947 = vsyncadd (%p4193_p13), %s389_s2, 4294967040  ;;  %s407_s1 = scalar_lea.sflag [#allocation10], %s399_s11  ;;  %s410_s13 = scalar_lea.vmem [#allocation9], %s3537_s8 }
  0xdd   : > { %2949 = dma.done.wait (%p4193_p13), %s407_s1, 256  }
  0xde   : > { %2951 = vsyncadd (%p4193_p13), %s407_s1, 4294967040  ;;  %s4194_s30 = sld [smem:[#allocation28_spill]]  ;;  %s4195_s11 = sld [smem:[#allocation32_spill]] }
  0xe4   : > { %s3550_s21 = sand.u32 1, %s4194_s30   ;;  %p2316_p5 = scmp.ne.s32.totalorder %s4195_s11, 0 }
  0xe5   : > { %s2313_s27 = sshll.u32 %s3550_s21, 5  ;;  %s2314_s0 = sshll.u32 %s3550_s21, 4  ;;  %v3046_v0 = vmov (!%p2316_p5), 0.0  }
  0xe6   : > { %s3554_s15 = scalar_lea.vmem [#allocation11], %s2313_s27  ;;  %s3556_s25 = scalar_lea.vmem [#allocation12], %s2314_s0  ;;  %478 = vst [vmem:[#allocation2] sm:$0xff] (!%p2316_p5), %v3046_v0  ;;  %479 = vst [vmem:[#allocation2 + $0x8] sm:$0xff] (!%p2316_p5), %v3046_v0 }
  0xe7   : > { %s3558_s2 = scalar_lea.vmem [#allocation14], %s2314_s0  ;;  %477 = sbr.rel (%p2316_p5) target bundleno = 238 (0xee), region = 60  ;;  %480 = vst [vmem:[#allocation2 + $0x10] sm:$0xff] (!%p2316_p5), %v3046_v0  ;;  %481 = vst [vmem:[#allocation2 + $0x18] sm:$0xff] (!%p2316_p5), %v3046_v0 }
  0xe8   : > { %482 = vst [vmem:[#allocation2 + $0x20] sm:$0xff] (!%p2316_p5), %v3046_v0  ;;  %483 = vst [vmem:[#allocation2 + $0x28] sm:$0xff] (!%p2316_p5), %v3046_v0 }
  0xe9   : > { %484 = vst [vmem:[#allocation2 + $0x30] sm:$0xff] (!%p2316_p5), %v3046_v0  ;;  %485 = vst [vmem:[#allocation2 + $0x38] sm:$0xff] (!%p2316_p5), %v3046_v0 }
  0xee PF: > { %v2663_v1 = vld [vmem:[%s3530_s10 + $0x4] ss:$16 sps:$4 sm:$0xff]   ;;  %v2665_v2 = vld [vmem:[%s3530_s10 + $0xc] ss:$16 sps:$4 sm:$0xff]   ;;  %v3047_v3 = vmov 0   ;;  %s4196_s23 = sld [smem:[#allocation32_spill]] }
  0xef   : > { %726 = vmatprep.mubr.bf16.mxu0 %v3047_v3  ;;  %769 = vmatprep.mubr.bf16.mxu1 %v3047_v3  ;;  %v2667_v4 = vld [vmem:[%s3530_s10] ss:$16 sps:$4 sm:$0xff]   ;;  %v2668_v5 = vld [vmem:[%s3530_s10 + $0x8] ss:$16 sps:$4 sm:$0xff]   ;;  %v2669_v6 = vld [vmem:[%s3530_s10 + $0x24] ss:$16 sps:$4 sm:$0xff]  }
  0xf0   : > { %694 = vmatprep.subr.bf16.mxu0 %v2663_v1  ;;  %737 = vmatprep.subr.bf16.mxu1 %v2665_v2  ;;  %v2671_v7 = vld [vmem:[%s3530_s10 + $0x2c] ss:$16 sps:$4 sm:$0xff]   ;;  %v2673_v8 = vld [vmem:[%s3530_s10 + $0x20] ss:$16 sps:$4 sm:$0xff]   ;;  %v2674_v9 = vld [vmem:[%s3530_s10 + $0x28] ss:$16 sps:$4 sm:$0xff]  }
  0xf1   : > { %695 = vmatpush1.bf16.msra.mxu0 %v2667_v4  ;;  %738 = vmatpush1.bf16.msra.mxu1 %v2668_v5  ;;  %v2675_v10 = vld [vmem:[%s3530_s10 + $0x44] ss:$16 sps:$4 sm:$0xff]   ;;  %v2677_v11 = vld [vmem:[%s3530_s10 + $0x4c] ss:$16 sps:$4 sm:$0xff]   ;;  %v2679_v12 = vld [vmem:[%s3530_s10 + $0x40] ss:$16 sps:$4 sm:$0xff]  }
  0xf2   : > { %696 = vmatprep.subr.bf16.mxu0 %v2669_v6  ;;  %739 = vmatprep.subr.bf16.mxu1 %v2671_v7  ;;  %v2680_v13 = vld [vmem:[%s3530_s10 + $0x48] ss:$16 sps:$4 sm:$0xff]   ;;  %v2681_v14 = vld [vmem:[%s3530_s10 + $0x64] ss:$16 sps:$4 sm:$0xff]   ;;  %v2683_v15 = vld [vmem:[%s3530_s10 + $0x6c] ss:$16 sps:$4 sm:$0xff]  }
  0xf3   : > { %v2685_v16 = vld [vmem:[%s3530_s10 + $0x60] ss:$16 sps:$4 sm:$0xff]   ;;  %v2686_v17 = vld [vmem:[%s3530_s10 + $0x68] ss:$16 sps:$4 sm:$0xff]   ;;  %v2687_v18 = vld [vmem:[%s3530_s10 + $0x84] ss:$16 sps:$4 sm:$0xff]  }
  0xf4   : > { %v2689_v19 = vld [vmem:[%s3530_s10 + $0x8c] ss:$16 sps:$4 sm:$0xff]   ;;  %v2691_v20 = vld [vmem:[%s3530_s10 + $0x80] ss:$16 sps:$4 sm:$0xff]   ;;  %v2692_v21 = vld [vmem:[%s3530_s10 + $0x88] ss:$16 sps:$4 sm:$0xff]  }
  0xf5   : > { %697 = vmatpush1.bf16.msra.mxu0 %v2673_v8  ;;  %740 = vmatpush1.bf16.msra.mxu1 %v2674_v9  ;;  %v2693_v22 = vld [vmem:[%s3530_s10 + $0xa4] ss:$16 sps:$4 sm:$0xff]   ;;  %v2695_v23 = vld [vmem:[%s3530_s10 + $0xac] ss:$16 sps:$4 sm:$0xff]   ;;  %v2697_v24 = vld [vmem:[%s3530_s10 + $0xa0] ss:$16 sps:$4 sm:$0xff]  }
  0xf6   : > { %698 = vmatprep.subr.bf16.mxu0 %v2675_v10  ;;  %741 = vmatprep.subr.bf16.mxu1 %v2677_v11  ;;  %v2698_v25 = vld [vmem:[%s3530_s10 + $0xa8] ss:$16 sps:$4 sm:$0xff]   ;;  %v2699_v26 = vld [vmem:[%s3530_s10 + $0xc4] ss:$16 sps:$4 sm:$0xff]   ;;  %v2701_v27 = vld [vmem:[%s3530_s10 + $0xcc] ss:$16 sps:$4 sm:$0xff]  }
  0xf7   : > { %v2703_v28 = vld [vmem:[%s3530_s10 + $0xc0] ss:$16 sps:$4 sm:$0xff]   ;;  %v2704_v29 = vld [vmem:[%s3530_s10 + $0xc8] ss:$16 sps:$4 sm:$0xff]   ;;  %v2705_v30 = vld [vmem:[%s3530_s10 + $0xe4] ss:$16 sps:$4 sm:$0xff]  }
  0xf8   : > { %v2707_v31 = vld [vmem:[%s3530_s10 + $0xec] ss:$16 sps:$4 sm:$0xff]   ;;  %v2709_v32 = vld [vmem:[%s3530_s10 + $0xe0] ss:$16 sps:$4 sm:$0xff]   ;;  %v2710_v33 = vld [vmem:[%s3530_s10 + $0xe8] ss:$16 sps:$4 sm:$0xff]  }
  0xf9   : > { %699 = vmatpush1.bf16.msra.mxu0 %v2679_v12  ;;  %742 = vmatpush1.bf16.msra.mxu1 %v2680_v13  ;;  %v2711_v34 = vld [vmem:[%s383_s24] sm:$0xff]   ;;  %v488_v36 = vld [vmem:[#allocation2 + $0x10] sm:$0xff]  ;;  %v489_v38 = vld [vmem:[#allocation2 + $0x18] sm:$0xff]  ;;  %p2350_p7 = scmp.ne.s32.totalorder %s4196_s23, 1 }
  0xfa   : > { %700 = vmatprep.subr.bf16.mxu0 %v2681_v14  ;;  %743 = vmatprep.subr.bf16.mxu1 %v2683_v15  ;;  %v486_v35 = vld [vmem:[#allocation2] sm:$0xff]  ;;  %v487_v37 = vld [vmem:[#allocation2 + $0x8] sm:$0xff]  ;;  %v492_v42 = vld [vmem:[#allocation2 + $0x30] sm:$0xff]  ;;  %s3048_s9 = smov (!%p2350_p7), 64   ;;  %v3049_v5 = vmov (!%p2350_p7), 1983009808   ;;  %v833_v7 = vlaneseq (!%p2350_p7) }
  0xfb   : > { %v490_v41 = vld [vmem:[#allocation2 + $0x20] sm:$0xff]  ;;  %v491_v47 = vld [vmem:[#allocation2 + $0x28] sm:$0xff]  ;;  %v493_v48 = vld [vmem:[#allocation2 + $0x38] sm:$0xff]  ;;  %v831_v6 = vunpack.c.l.s4 (!%p2350_p7), %v3049_v5  ;;  %v3050_v10 = vmov (!%p2350_p7), 1934713408   ;;  %s3052_s24 = smov (!%p2350_p7), 96  }
  0xfc   : > { %v3605_v9 = vshrl.u32 (!%p2350_p7), %v833_v7, 7  ;;  %v863_v11 = vunpack.c.l.s4 (!%p2350_p7), %v3050_v10  ;;  %s3053_s10 = smov (!%p2350_p7), 32   ;;  %vm1156_vm0 = vcmask (!%p2350_p7), 261120   ;;  %vm1197_vm1 = vcmask (!%p2350_p7), 523264   ;;  %s4197_s1 = sld [smem:[#allocation47_spill]] (!%p2350_p7) }
  0xfd   : > { %701 = vmatpush1.bf16.msra.mxu0 %v2685_v16  ;;  %744 = vmatpush1.bf16.msra.mxu1 %v2686_v17  ;;  %v832_v8 = vunpack.c.0.s8 (!%p2350_p7), %v831_v6  ;;  %vm1294_vm2 = vcmask (!%p2350_p7), 519168  }
  0xfe   : > { %702 = vmatprep.subr.bf16.mxu0 %v2687_v18  ;;  %745 = vmatprep.subr.bf16.mxu1 %v2689_v19  ;;  %v864_v13 = vunpack.c.0.s8 (!%p2350_p7), %v863_v11 }
  0xff   : > { %v3608_v12 = vsub.s32 (!%p2350_p7), %v832_v8, %v3605_v9 }
 0x101   : > { %703 = vmatpush1.bf16.msra.mxu0 %v2691_v20  ;;  %746 = vmatpush1.bf16.msra.mxu1 %v2692_v21  ;;  %v3613_v20 = vsub.s32 (!%p2350_p7), %v864_v13, %v3605_v9 }
 0x102   : > { %704 = vmatprep.subr.bf16.mxu0 %v2693_v22  ;;  %747 = vmatprep.subr.bf16.mxu1 %v2695_v23 }
 0x105   : > { %705 = vmatpush1.bf16.msra.mxu0 %v2697_v24  ;;  %748 = vmatpush1.bf16.msra.mxu1 %v2698_v25 }
 0x106   : > { %706 = vmatprep.subr.bf16.mxu0 %v2699_v26  ;;  %749 = vmatprep.subr.bf16.mxu1 %v2701_v27 }
 0x109   : > { %707 = vmatpush1.bf16.msra.mxu0 %v2703_v28  ;;  %750 = vmatpush1.bf16.msra.mxu1 %v2704_v29 }
 0x10a   : > { %708 = vmatprep.subr.bf16.mxu0 %v2705_v30  ;;  %751 = vmatprep.subr.bf16.mxu1 %v2707_v31 }
 0x10d   : > { %709 = vmatpush1.bf16.msra.mxu0 %v2709_v32  ;;  %752 = vmatpush1.bf16.msra.mxu1 %v2710_v33 }
 0x110   : > { %727 = vmatmul.mubr.bf16.vlgmr.msra.gmra.mrb[0].mxu0 %v2711_v34  ;;  %770 = vmatmul.mubr.bf16.vlgmr.msra.gmra.mrb[0].mxu1 %v2711_v34 }
 0x1e3   : > { %v728_v39 = vpop.f32.mrb[0].mxu0  ;;  %v771_v40 = vpop.f32.mrb[0].mxu1  ;;  %799 = sbr.rel (%p2350_p7) target bundleno = 969 (0x3c9), region = 64 }
 0x1e4   : > { %v780_v43 = vadd.f32 %v728_v39, %v486_v35  ;;  %v782_v44 = vadd.f32 %v771_v40, %v488_v36  ;;  %v730_v45 = vpop.f32.mrb[1].mxu0  ;;  %v773_v46 = vpop.f32.mrb[1].mxu1 }
 0x1e5   : > { %v781_v49 = vadd.f32 %v730_v45, %v487_v37  ;;  %v783_v50 = vadd.f32 %v773_v46, %v489_v38  ;;  %v732_v51 = vpop.f32.mrb[2].mxu0  ;;  %v775_v52 = vpop.f32.mrb[2].mxu1  ;;  %v3051_v37 = vmov (!%p2350_p7), 0.0  }
 0x1e6   : > { %788 = vst [vmem:[#allocation2] sm:$0xff] %v780_v43  ;;  %790 = vst [vmem:[#allocation2 + $0x10] sm:$0xff] %v782_v44  ;;  %v784_v53 = vadd.f32 %v732_v51, %v490_v41  ;;  %v786_v54 = vadd.f32 %v775_v52, %v492_v42  ;;  %v734_v55 = vpop.f32.mrb[3].mxu0  ;;  %v777_v56 = vpop.f32.mrb[3].mxu1 }
 0x1e7   : > { %789 = vst [vmem:[#allocation2 + $0x8] sm:$0xff] %v781_v49  ;;  %791 = vst [vmem:[#allocation2 + $0x18] sm:$0xff] %v783_v50  ;;  %v785_v57 = vadd.f32 %v734_v55, %v491_v47  ;;  %v787_v58 = vadd.f32 %v777_v56, %v493_v48 }
 0x1e8   : > { %792 = vst [vmem:[#allocation2 + $0x20] sm:$0xff] %v784_v53  ;;  %794 = vst [vmem:[#allocation2 + $0x30] sm:$0xff] %v786_v54 }
 0x1e9   : > { %793 = vst [vmem:[#allocation2 + $0x28] sm:$0xff] %v785_v57  ;;  %795 = vst [vmem:[#allocation2 + $0x38] sm:$0xff] %v787_v58 }
 0x1ed   : > { %v800_v60 = vld [vmem:[#allocation2] sm:$0xff]  ;;  %v802_v3 = vld [vmem:[#allocation2 + $0x10] sm:$0xff] }
 0x1ee   : > { %v801_v59 = vld [vmem:[#allocation2 + $0x8] sm:$0xff]  ;;  %814 = vrot.lane.b32.xlu0 %v800_v60, %s3048_s9  ;;  %v1312_v38 = vcombine.high %v802_v3, %v3051_v37 }
 0x1ef   : > { %822 = vrot.lane.b32.xlu1 %v801_v59, %s3048_s9  ;;  %v828_v61 = vcombine.low %v800_v60, %v801_v59  ;;  %v829_v62 = vcombine.high %v800_v60, %v801_v59  ;;  %v804_v0 = vld [vmem:[#allocation2 + $0x20] sm:$0xff]  ;;  %v3600_v4 = vld [vmem:[#allocation2 + $0x30] sm:$0xff] }
 0x1f0   : > { %v805_v63 = vld [vmem:[#allocation2 + $0x28] sm:$0xff] }
 0x1f1   : > { %v896_v1 = vcombine.low %v804_v0, %v805_v63  ;;  %v897_v2 = vcombine.high %v804_v0, %v805_v63  ;;  %v836_v16 = vrot.slane %v828_v61, %v3608_v12  ;;  %v843_v17 = vrot.slane %v829_v62, %v3608_v12 }
 0x1f2   : > { %816 = vrot.lane.b32.xlu0 %v804_v0, %s3048_s9 }
 0x1f3   : > { %824 = vrot.lane.b32.xlu1 %v805_v63, %s3048_s9  ;;  %v904_v29 = vrot.slane %v896_v1, %v3608_v12  ;;  %v911_v30 = vrot.slane %v897_v2, %v3608_v12 }
 0x1f6   : > { %1305 = vrot.lane.b32.xlu0 %v802_v3, %s3048_s9 }
 0x1f7   : > { %1307 = vrot.lane.b32.xlu1 %v3600_v4, %s3048_s9 }
 0x260   : > { %v815_v15 = vpop.permute.xlu0 %814 }
 0x261   : > { %v823_v14 = vpop.permute.xlu1 %822 }
 0x262   : > { %v844_v18 = vcombine.low %v815_v15, %v823_v14  ;;  %v845_v19 = vcombine.high %v815_v15, %v823_v14 }
 0x264   : > { %v852_v21 = vrot.slane %v844_v18, %v3608_v12  ;;  %v859_v22 = vrot.slane %v845_v19, %v3608_v12  ;;  %v817_v24 = vpop.permute.xlu0 %816 }
 0x265   : > { %v825_v23 = vpop.permute.xlu1 %824 }
 0x266   : > { %v860_v25 = vcombine.low %v836_v16, %v852_v21  ;;  %v861_v26 = vcombine.high %v836_v16, %v852_v21  ;;  %v876_v27 = vcombine.low %v843_v17, %v859_v22  ;;  %v877_v28 = vcombine.high %v843_v17, %v859_v22 }
 0x267   : > { %v912_v31 = vcombine.low %v817_v24, %v825_v23  ;;  %v913_v32 = vcombine.high %v817_v24, %v825_v23  ;;  %v1326_v22 = vrot.slane %v1312_v38, %v3608_v12 }
 0x268   : > { %v868_v33 = vrot.slane %v860_v25, %v3613_v20  ;;  %v875_v34 = vrot.slane %v861_v26, %v3613_v20  ;;  %v884_v35 = vrot.slane %v876_v27, %v3613_v20  ;;  %v891_v36 = vrot.slane %v877_v28, %v3613_v20  ;;  %v1306_v11 = vpop.permute.xlu0 %1305 }
 0x269   : > { %v920_v39 = vrot.slane %v912_v31, %v3608_v12  ;;  %v927_v40 = vrot.slane %v913_v32, %v3608_v12  ;;  %v1327_v23 = vcombine.high %v1306_v11, %v3051_v37  ;;  %v1334_v24 = vrot.slane %v1306_v11, %v3608_v12  ;;  %v1308_v25 = vpop.permute.xlu1 %1307 }
 0x26a   : > { %v964_v41 = vcombine.low %v868_v33, %v875_v34  ;;  %v2351_v42 = vcombine.high %v868_v33, %v875_v34  ;;  %v980_v43 = vcombine.low %v884_v35, %v891_v36  ;;  %v2352_v44 = vcombine.high %v884_v35, %v891_v36 }
 0x26b   : > { %v928_v45 = vcombine.low %v904_v29, %v920_v39  ;;  %v929_v46 = vcombine.high %v904_v29, %v920_v39  ;;  %v944_v47 = vcombine.low %v911_v30, %v927_v40  ;;  %v945_v48 = vcombine.high %v911_v30, %v927_v40  ;;  %v2363_v30 = vld.sshfl [vmem:[#allocation2 + $0x10] sm:$0xff pattern:$0x76325410] }
 0x26c   : > { %v971_v49 = vrot.slane %v964_v41, %v3608_v12  ;;  %v979_v50 = vrot.slane %v2351_v42, %v3608_v12  ;;  %v987_v51 = vrot.slane %v980_v43, %v3608_v12  ;;  %v995_v52 = vrot.slane %v2352_v44, %v3608_v12 }
 0x26d   : > { %v936_v53 = vrot.slane %v928_v45, %v3613_v20  ;;  %v943_v54 = vrot.slane %v929_v46, %v3613_v20  ;;  %v952_v55 = vrot.slane %v944_v47, %v3613_v20  ;;  %v959_v56 = vrot.slane %v945_v48, %v3613_v20 }
 0x26e   : > { %v996_v57 = vcombine.low %v971_v49, %v979_v50  ;;  %v1012_v58 = vcombine.low %v987_v51, %v995_v52  ;;  %v997_v59 = vcombine.high %v971_v49, %v979_v50  ;;  %v1013_v60 = vcombine.high %v987_v51, %v995_v52  ;;  %v2364_v49 = vld.sshfl [vmem:[#allocation2 + $0x30] sm:$0xff pattern:$0x76325410] }
 0x26f   : > { %v1032_v61 = vcombine.low %v936_v53, %v943_v54  ;;  %v2353_v62 = vcombine.high %v936_v53, %v943_v54  ;;  %v1048_v63 = vcombine.low %v952_v55, %v959_v56  ;;  %v2354_v0 = vcombine.high %v952_v55, %v959_v56 }
 0x270   : > { %v1004_v1 = vrot.slane %v996_v57, %v3613_v20  ;;  %v1020_v2 = vrot.slane %v1012_v58, %v3613_v20  ;;  %v1011_v3 = vrot.slane %v997_v59, %v3613_v20  ;;  %v1027_v5 = vrot.slane %v1013_v60, %v3613_v20 }
 0x271   : > { %v1039_v6 = vrot.slane %v1032_v61, %v3608_v12  ;;  %v1047_v7 = vrot.slane %v2353_v62, %v3608_v12  ;;  %v1055_v8 = vrot.slane %v1048_v63, %v3608_v12  ;;  %v1063_v10 = vrot.slane %v2354_v0, %v3608_v12 }
 0x272   : > { %v3642_v13 = vcombine.low %v1004_v1, %v1020_v2  ;;  %v3644_v14 = vcombine.high %v1004_v1, %v1020_v2  ;;  %v3646_v15 = vcombine.low %v1011_v3, %v1027_v5  ;;  %v3648_v16 = vcombine.high %v1011_v3, %v1027_v5 }
 0x273   : > { %v1064_v17 = vcombine.low %v1039_v6, %v1047_v7  ;;  %v1080_v18 = vcombine.low %v1055_v8, %v1063_v10  ;;  %v1065_v19 = vcombine.high %v1039_v6, %v1047_v7  ;;  %v1081_v21 = vcombine.high %v1055_v8, %v1063_v10 }
 0x274   : > { %1108 = vrot.lane.b32.xlu0 %v3642_v13, %s3052_s24  ;;  %v1379_v31 = vcombine.high %v3600_v4, %v3051_v37  ;;  %v1341_v32 = vrot.slane %v1327_v23, %v3608_v12  ;;  %v1394_v36 = vcombine.high %v1308_v25, %v3051_v37  ;;  %v1342_v38 = vcombine.low %v2363_v30, %v1334_v24 }
 0x275   : > { %v1072_v26 = vrot.slane %v1064_v17, %v3613_v20  ;;  %v1088_v27 = vrot.slane %v1080_v18, %v3613_v20  ;;  %v1079_v28 = vrot.slane %v1065_v19, %v3613_v20  ;;  %v1095_v29 = vrot.slane %v1081_v21, %v3613_v20 }
 0x276   : > { %v1343_v39 = vcombine.high %v2363_v30, %v1334_v24  ;;  %v1358_v40 = vcombine.low %v1326_v22, %v1341_v32  ;;  %v1359_v41 = vcombine.high %v1326_v22, %v1341_v32  ;;  %v1393_v4 = vrot.slane %v1379_v31, %v3608_v12 }
 0x277   : > { %v3662_v33 = vcombine.low %v1072_v26, %v1088_v27  ;;  %v3664_v34 = vcombine.high %v1072_v26, %v1088_v27  ;;  %v3666_v35 = vcombine.low %v1079_v28, %v1095_v29  ;;  %v1401_v42 = vrot.slane %v1308_v25, %v3608_v12 }
 0x278   : > { %1112 = vrot.lane.b32.xlu0 %v3644_v14, %s3052_s24  ;;  %v1408_v43 = vrot.slane %v1394_v36, %v3608_v12  ;;  %v3676_v44 = vcombine.high %v1079_v28, %v1095_v29  ;;  %v1350_v45 = vrot.slane %v1342_v38, %v3613_v20  ;;  %v1357_v46 = vrot.slane %v1343_v39, %v3613_v20 }
 0x279   : > { %1110 = vrot.lane.b32.xlu1 %v3662_v33, %s3052_s24  ;;  %v1366_v47 = vrot.slane %v1358_v40, %v3613_v20  ;;  %v1373_v48 = vrot.slane %v1359_v41, %v3613_v20  ;;  %v1409_v50 = vcombine.low %v2364_v49, %v1401_v42  ;;  %v1410_v51 = vcombine.high %v2364_v49, %v1401_v42  ;;  %v3750_v41 = vld [vmem:[%s410_s13] sm:$0xff] }
 0x27a   : > { %v1425_v52 = vcombine.low %v1393_v4, %v1408_v43  ;;  %v1426_v53 = vcombine.high %v1393_v4, %v1408_v43  ;;  %v1445_v54 = vcombine.low %v1350_v45, %v1357_v46  ;;  %v2365_v55 = vcombine.high %v1350_v45, %v1357_v46  ;;  %v3754_v4 = vld [vmem:[%s401_s7] sm:$0xff] }
 0x27b   : > { %v1461_v56 = vcombine.low %v1366_v47, %v1373_v48  ;;  %v2366_v57 = vcombine.high %v1366_v47, %v1373_v48  ;;  %v1417_v58 = vrot.slane %v1409_v50, %v3613_v20  ;;  %v1424_v59 = vrot.slane %v1410_v51, %v3613_v20  ;;  %v3762_v48 = vld [vmem:[%s410_s13 + $0x8] sm:$0xff] }
 0x27c   : > { %1116 = vrot.lane.b32.xlu0 %v3646_v15, %s3052_s24  ;;  %v1433_v60 = vrot.slane %v1425_v52, %v3613_v20  ;;  %v1440_v61 = vrot.slane %v1426_v53, %v3613_v20  ;;  %v1452_v62 = vrot.slane %v1445_v54, %v3608_v12  ;;  %v1460_v63 = vrot.slane %v2365_v55, %v3608_v12  ;;  %v3768_v51 = vld [vmem:[%s401_s7 + $0x8] sm:$0xff] }
 0x27d   : > { %1114 = vrot.lane.b32.xlu1 %v3664_v34, %s3052_s24  ;;  %v1468_v0 = vrot.slane %v1461_v56, %v3608_v12  ;;  %v1476_v1 = vrot.slane %v2366_v57, %v3608_v12  ;;  %v1495_v2 = vcombine.low %v1417_v58, %v1424_v59  ;;  %v2367_v3 = vcombine.high %v1417_v58, %v1424_v59 }
 0x27e   : > { %v1511_v5 = vcombine.low %v1433_v60, %v1440_v61  ;;  %v2368_v6 = vcombine.high %v1433_v60, %v1440_v61  ;;  %v1477_v7 = vcombine.low %v1452_v62, %v1460_v63  ;;  %v1165_v47 = vmul.f32 %v3642_v13, %v3754_v4 }
 0x27f   : > { %v1485_v8 = vcombine.low %v1468_v0, %v1476_v1  ;;  %v1502_v10 = vrot.slane %v1495_v2, %v3608_v12  ;;  %v1510_v11 = vrot.slane %v2367_v3, %v3608_v12  ;;  %v1167_v56 = vmul.f32 %v3644_v14, %v3754_v4 }
 0x280   : > { %1120 = vrot.lane.b32.xlu0 %v3648_v16, %s3052_s24  ;;  %v1518_v17 = vrot.slane %v1511_v5, %v3608_v12  ;;  %v1526_v18 = vrot.slane %v2368_v6, %v3608_v12  ;;  %v1484_v19 = vrot.slane %v1477_v7, %v3613_v20  ;;  %v1166_v58 = vmul.f32 %v3662_v33, %v3768_v51 }
 0x281   : > { %1118 = vrot.lane.b32.xlu1 %v3666_v35, %s3052_s24  ;;  %v1492_v21 = vrot.slane %v1485_v8, %v3613_v20  ;;  %v1527_v22 = vcombine.low %v1502_v10, %v1510_v11  ;;  %v1168_v6 = vmul.f32 %v3664_v34, %v3768_v51 }
 0x282   : > { %v1535_v23 = vcombine.low %v1518_v17, %v1526_v18 }
 0x283   : > { %v3718_v24 = vcombine.low %v1484_v19, %v1492_v21  ;;  %v1534_v25 = vrot.slane %v1527_v22, %v3613_v20  ;;  %v3728_v27 = vcombine.high %v1484_v19, %v1492_v21  ;;  %v1171_v22 = vmul.f32 %v3648_v16, %v3754_v4 }
 0x284   : > { %1132 = vrot.lane.b32.xlu0 %v3642_v13, %s3053_s10  ;;  %v1542_v26 = vrot.slane %v1535_v23, %v3613_v20 }
 0x285   : > { %1122 = vrot.lane.b32.xlu1 %v3676_v44, %s3052_s24 }
 0x286   : > { %v3730_v28 = vcombine.low %v1534_v25, %v1542_v26  ;;  %v3736_v29 = vcombine.high %v1534_v25, %v1542_v26  ;;  %v1170_v26 = vmul.f32 %v3666_v35, %v3768_v51 }
 0x288   : > { %1136 = vrot.lane.b32.xlu0 %v3644_v14, %s3053_s10 }
 0x289   : > { %1134 = vrot.lane.b32.xlu1 %v3662_v33, %s3053_s10  ;;  %v1169_v33 = vmul.f32 %v3646_v15, %v3754_v4 }
 0x28c   : > { %1140 = vrot.lane.b32.xlu0 %v3646_v15, %s3053_s10 }
 0x28d   : > { %1138 = vrot.lane.b32.xlu1 %v3664_v34, %s3053_s10 }
 0x290   : > { %1144 = vrot.lane.b32.xlu0 %v3648_v16, %s3053_s10 }
 0x291   : > { %1142 = vrot.lane.b32.xlu1 %v3666_v35, %s3053_s10 }
 0x294   : > { %1549 = vrot.lane.b32.xlu0 %v3718_v24, %s3052_s24 }
 0x295   : > { %1146 = vrot.lane.b32.xlu1 %v3676_v44, %s3053_s10 }
 0x298   : > { %1553 = vrot.lane.b32.xlu0 %v3728_v27, %s3052_s24 }
 0x299   : > { %1551 = vrot.lane.b32.xlu1 %v3730_v28, %s3052_s24 }
 0x29c   : > { %1561 = vrot.lane.b32.xlu0 %v3718_v24, %s3053_s10 }
 0x29d   : > { %1555 = vrot.lane.b32.xlu1 %v3736_v29, %s3052_s24 }
 0x2a0   : > { %1565 = vrot.lane.b32.xlu0 %v3728_v27, %s3053_s10 }
 0x2a1   : > { %1563 = vrot.lane.b32.xlu1 %v3730_v28, %s3053_s10 }
 0x2a5   : > { %1567 = vrot.lane.b32.xlu1 %v3736_v29, %s3053_s10 }
 0x2e6   : > { %v1109_v30 = vpop.permute.xlu0 %1108 }
 0x2ea   : > { %v1113_v31 = vpop.permute.xlu0 %1112 }
 0x2eb   : > { %v1111_v32 = vpop.permute.xlu1 %1110 }
 0x2ee   : > { %v1117_v36 = vpop.permute.xlu0 %1116 }
 0x2ef   : > { %v1115_v38 = vpop.permute.xlu1 %1114 }
 0x2f2   : > { %v1121_v39 = vpop.permute.xlu0 %1120 }
 0x2f3   : > { %v1119_v40 = vpop.permute.xlu1 %1118 }
 0x2f6   : > { %v1133_v42 = vpop.permute.xlu0 %1132 }
 0x2f7   : > { %v1123_v43 = vpop.permute.xlu1 %1122  ;;  %v1157_v45 = vsel %vm1156_vm0, %v1109_v30, %v1133_v42 }
 0x2f8   : > { %v1173_v46 = vmul.f32 %v1157_v45, %v3750_v41  ;;  %v1172_v45 = vmul.f32 %v3676_v44, %v3768_v51 }
 0x2fa   : > { %v1137_v49 = vpop.permute.xlu0 %1136  ;;  %v3764_v50 = vadd.f32 %v1173_v46, %v1165_v47 }
 0x2fb   : > { %v1135_v52 = vpop.permute.xlu1 %1134  ;;  %v1159_v53 = vsel %vm1156_vm0, %v1113_v31, %v1137_v49 }
 0x2fc   : > { %v1158_v54 = vsel %vm1156_vm0, %v1111_v32, %v1135_v52  ;;  %v1175_v55 = vmul.f32 %v1159_v53, %v3750_v41  ;;  %v1189_v13 = vmul.f32 %v3764_v50, %v3764_v50 }
 0x2fd   : > { %v1174_v57 = vmul.f32 %v1158_v54, %v3762_v48 }
 0x2fe   : > { %v1141_v59 = vpop.permute.xlu0 %1140  ;;  %v1198_v60 = vsel %vm1197_vm1, %v1189_v13, 0.0  ;;  %v3781_v61 = vadd.f32 %v1175_v55, %v1167_v56 }
 0x2ff   : > { %v1139_v62 = vpop.permute.xlu1 %1138  ;;  %v1161_v63 = vsel %vm1156_vm0, %v1117_v36, %v1141_v59  ;;  %1199 = vadd.xlane.f32.xlu0 %v1198_v60  ;;  %v3784_v0 = vadd.f32 %v1174_v57, %v1166_v58  ;;  %v1577_v57 = vmul.f32 %v3718_v24, %v3754_v4  ;;  %v1578_v24 = vmul.f32 %v3730_v28, %v3768_v51 }
 0x300   : > { %v1160_v1 = vsel %vm1156_vm0, %v1115_v38, %v1139_v62  ;;  %v1177_v14 = vmul.f32 %v1161_v63, %v3750_v41  ;;  %v1191_v2 = vmul.f32 %v3781_v61, %v3781_v61  ;;  %v1580_v28 = vmul.f32 %v3736_v29, %v3768_v51  ;;  %v3876_v29 = vld [vmem:[#allocation2 + $0x38] sm:$0xff] }
 0x301   : > { %v1176_v3 = vmul.f32 %v1160_v1, %v3762_v48  ;;  %v1190_v5 = vmul.f32 %v3784_v0, %v3784_v0 }
 0x302   : > { %v1145_v7 = vpop.permute.xlu0 %1144  ;;  %v1204_v8 = vsel %vm1197_vm1, %v1191_v2, 0.0  ;;  %v3798_v10 = vadd.f32 %v1177_v14, %v1169_v33  ;;  %v1579_v2 = vmul.f32 %v3728_v27, %v3754_v4 }
 0x303   : > { %v1143_v11 = vpop.permute.xlu1 %1142  ;;  %v1163_v17 = vsel %vm1156_vm0, %v1121_v39, %v1145_v7  ;;  %v1201_v18 = vsel %vm1197_vm1, %v1190_v5, 0.0  ;;  %1205 = vadd.xlane.f32.xlu0 %v1204_v8  ;;  %v3802_v15 = vadd.f32 %v1176_v3, %v1168_v6 }
 0x304   : > { %v1162_v19 = vsel %vm1156_vm0, %v1119_v40, %v1143_v11  ;;  %v1179_v21 = vmul.f32 %v1163_v17, %v3750_v41  ;;  %1202 = vadd.xlane.f32.xlu1 %v1201_v18  ;;  %v1193_v34 = vmul.f32 %v3798_v10, %v3798_v10 }
 0x305   : > { %v1178_v23 = vmul.f32 %v1162_v19, %v3762_v48  ;;  %v1192_v25 = vmul.f32 %v3802_v15, %v3802_v15 }
 0x306   : > { %v1550_v30 = vpop.permute.xlu0 %1549  ;;  %v1210_v31 = vsel %vm1197_vm1, %v1193_v34, 0.0  ;;  %v3816_v32 = vadd.f32 %v1179_v21, %v1171_v22 }
 0x307   : > { %v1147_v36 = vpop.permute.xlu1 %1146  ;;  %v1207_v38 = vsel %vm1197_vm1, %v1192_v25, 0.0  ;;  %v3819_v39 = vadd.f32 %v1178_v23, %v1170_v26  ;;  %v1246_v23 = vld [vmem:[%s4197_s1] sm:$0x1] }
 0x308   : > { %v1164_v16 = vsel %vm1156_vm0, %v1123_v43, %v1147_v36  ;;  %1211 = vadd.xlane.f32.xlu1 %v1210_v31  ;;  %1208 = vadd.xlane.f32.xlu0 %v1207_v38  ;;  %v1195_v40 = vmul.f32 %v3816_v32, %v3816_v32  ;;  %v1247_v31 = vmul.f32 8.0, %v1246_v23  ;;  %v1251_v36 = vsub.s32 0, %v3605_v9  ;;  %v2374_v23 = vld.sshfl [vmem:[#allocation2 + $0x18] sm:$0xff pattern:$0x76325410] }
 0x309   : > { %v1180_v42 = vmul.f32 %v1164_v16, %v3762_v48  ;;  %v1194_v35 = vmul.f32 %v3819_v39, %v3819_v39 }
 0x30a   : > { %v1554_v46 = vpop.permute.xlu0 %1553  ;;  %v1216_v47 = vsel %vm1197_vm1, %v1195_v40, 0.0 }
 0x30b   : > { %v1552_v49 = vpop.permute.xlu1 %1551  ;;  %v1213_v52 = vsel %vm1197_vm1, %v1194_v35, 0.0  ;;  %v3831_v43 = vadd.f32 %v1180_v42, %v1172_v45  ;;  %v1252_v35 = vrot.slane %v1247_v31, %v1251_v36 }
 0x30c   : > { %1217 = vadd.xlane.f32.xlu1 %v1216_v47  ;;  %1214 = vadd.xlane.f32.xlu0 %v1213_v52 }
 0x30d   : > { %v1196_v53 = vmul.f32 %v3831_v43, %v3831_v43 }
 0x30e   : > { %v1562_v54 = vpop.permute.xlu0 %1561 }
 0x30f   : > { %v1556_v55 = vpop.permute.xlu1 %1555  ;;  %v1573_v13 = vsel %vm1156_vm0, %v1550_v30, %v1562_v54  ;;  %v1219_v56 = vsel %vm1197_vm1, %v1196_v53, 0.0 }
 0x310   : > { %v1581_v44 = vmul.f32 %v1573_v13, %v3750_v41  ;;  %1220 = vadd.xlane.f32.xlu0 %v1219_v56 }
 0x312   : > { %v1566_v58 = vpop.permute.xlu0 %1565  ;;  %v3840_v59 = vadd.f32 %v1581_v44, %v1577_v57 }
 0x313   : > { %v1564_v60 = vpop.permute.xlu1 %1563  ;;  %v1575_v62 = vsel %vm1156_vm0, %v1554_v46, %v1566_v58 }
 0x314   : > { %v1574_v63 = vsel %vm1156_vm0, %v1552_v49, %v1564_v60  ;;  %v1583_v1 = vmul.f32 %v1575_v62, %v3750_v41  ;;  %v1589_v14 = vmul.f32 %v3840_v59, %v3840_v59 }
 0x315   : > { %v1582_v33 = vmul.f32 %v1574_v63, %v3762_v48 }
 0x316   : > { %v1593_v3 = vsel %vm1197_vm1, %v1589_v14, 0.0  ;;  %v3853_v5 = vadd.f32 %v1583_v1, %v1579_v2 }
 0x317   : > { %v1568_v6 = vpop.permute.xlu1 %1567  ;;  %1594 = vadd.xlane.f32.xlu1 %v1593_v3  ;;  %v3855_v7 = vadd.f32 %v1582_v33, %v1578_v24 }
 0x318   : > { %v1576_v41 = vsel %vm1156_vm0, %v1556_v55, %v1568_v6  ;;  %v1591_v8 = vmul.f32 %v3853_v5, %v3853_v5 }
 0x319   : > { %v1584_v27 = vmul.f32 %v1576_v41, %v3762_v48  ;;  %v1590_v4 = vmul.f32 %v3855_v7, %v3855_v7  ;;  %v3872_v48 = vld [vmem:[#allocation2 + $0x18] sm:$0xff] }
 0x31a   : > { %v1599_v11 = vsel %vm1197_vm1, %v1591_v8, 0.0 }
 0x31b   : > { %1600 = vadd.xlane.f32.xlu1 %v1599_v11  ;;  %v1596_v17 = vsel %vm1197_vm1, %v1590_v4, 0.0  ;;  %v3867_v18 = vadd.f32 %v1584_v27, %v1580_v28 }
 0x31c   : > { %1597 = vadd.xlane.f32.xlu0 %v1596_v17 }
 0x31d   : > { %v1592_v19 = vmul.f32 %v3867_v18, %v3867_v18 }
 0x31f   : > { %v1602_v21 = vsel %vm1197_vm1, %v1592_v19, 0.0 }
 0x320   : > { %1603 = vadd.xlane.f32.xlu0 %v1602_v21 }
 0x32c   : > { %1650 = vrot.lane.b32.xlu1 %v3872_v48, %s3048_s9 }
 0x336   : > { %1652 = vrot.lane.b32.xlu0 %v3876_v29, %s3048_s9 }
 0x38c   : > { %v1200_v51 = vpop.xlane.xlu0 %1199 }
 0x38d   : > { %v1222_v34 = vadd.f32 1e-05, %v1200_v51 }
 0x38f   : > { %2716 = vrsqrt.f32 %v1222_v34 }
 0x390   : > { %v1206_v22 = vpop.xlane.xlu0 %1205 }
 0x391   : > { %v1203_v25 = vpop.xlane.xlu1 %1202  ;;  %v1224_v26 = vadd.f32 1e-05, %v1206_v22 }
 0x392   : > { %v1223_v30 = vadd.f32 1e-05, %v1203_v25 }
 0x393   : > { %2718 = vrsqrt.f32 %v1224_v26 }
 0x394   : > { %2720 = vrsqrt.f32 %v1223_v30 }
 0x395   : > { %v1212_v38 = vpop.xlane.xlu1 %1211  ;;  %v1209_v16 = vpop.xlane.xlu0 %1208 }
 0x396   : > { %v1226_v40 = vadd.f32 1e-05, %v1212_v38  ;;  %v1225_v42 = vadd.f32 1e-05, %v1209_v16  ;;  %v1724_v38 = vcombine.high %v3876_v29, %v3051_v37 }
 0x398   : > { %2722 = vrsqrt.f32 %v1226_v40 }
 0x399   : > { %v2717_v45 = vpop.eup %2716  ;;  %2724 = vrsqrt.f32 %v1225_v42  ;;  %v1218_v46 = vpop.xlane.xlu1 %1217 }
 0x39a   : > { %v1215_v47 = vpop.xlane.xlu0 %1214  ;;  %v1238_v49 = vmul.f32 %v2717_v45, %v3764_v50  ;;  %v1228_v52 = vadd.f32 1e-05, %v1218_v46 }
 0x39b   : > { %v1227_v53 = vadd.f32 1e-05, %v1215_v47 }
 0x39c   : > { %v1254_v54 = vmul.f32 %v1252_v35, %v1238_v49  ;;  %2726 = vrsqrt.f32 %v1228_v52 }
 0x39d   : > { %v2719_v55 = vpop.eup %2718  ;;  %2728 = vrsqrt.f32 %v1227_v53  ;;  %v2375_v53 = vld.sshfl [vmem:[#allocation2 + $0x38] sm:$0xff pattern:$0x76325410] }
 0x39e   : > { %v1221_v9 = vpop.xlane.xlu0 %1220  ;;  %v2721_v13 = vpop.eup %2720  ;;  %v2403_v56 = vpack.c.bf16 %v1254_v54, %v1254_v54  ;;  %v1240_v44 = vmul.f32 %v2719_v55, %v3781_v61  ;;  %v1738_v55 = vrot.slane %v1724_v38, %v3608_v12 }
 0x39f   : > { %v1229_v57 = vadd.f32 1e-05, %v1221_v9  ;;  %v1239_v58 = vmul.f32 %v2721_v13, %v3784_v0 }
 0x3a0   : > { %1295 = vst.msk [vmem:[%s3554_s15] sm:$0xf] %vm1294_vm2, %v2403_v56  ;;  %v1256_v50 = vmul.f32 %v1252_v35, %v1240_v44 }
 0x3a1   : > { %2730 = vrsqrt.f32 %v1229_v57  ;;  %v1255_v60 = vmul.f32 %v1252_v35, %v1239_v58 }
 0x3a2   : > { %v2723_v62 = vpop.eup %2722  ;;  %v2405_v63 = vpack.c.bf16 %v1256_v50, %v1256_v50 }
 0x3a3   : > { %v2725_v1 = vpop.eup %2724  ;;  %v2404_v14 = vpack.c.bf16 %v1255_v60, %v1255_v60  ;;  %v1242_v2 = vmul.f32 %v2723_v62, %v3798_v10 }
 0x3a4   : > { %1297 = vst.msk [vmem:[%s3554_s15 + $0x8] sm:$0xf] %vm1294_vm2, %v2405_v63  ;;  %v1241_v33 = vmul.f32 %v2725_v1, %v3802_v15  ;;  %v1595_v61 = vpop.xlane.xlu1 %1594  ;;  %v1657_v15 = vcombine.high %v3872_v48, %v3051_v37 }
 0x3a5   : > { %1296 = vst.msk [vmem:[%s3554_s15 + $0x4] sm:$0xf] %vm1294_vm2, %v2404_v14  ;;  %v1258_v0 = vmul.f32 %v1252_v35, %v1242_v2  ;;  %v1605_v24 = vadd.f32 1e-05, %v1595_v61 }
 0x3a6   : > { %v2727_v3 = vpop.eup %2726  ;;  %v1257_v6 = vmul.f32 %v1252_v35, %v1241_v33  ;;  %v1671_v25 = vrot.slane %v1657_v15, %v3608_v12 }
 0x3a7   : > { %v2729_v41 = vpop.eup %2728  ;;  %v2407_v8 = vpack.c.bf16 %v1258_v0, %v1258_v0  ;;  %v1244_v27 = vmul.f32 %v2727_v3, %v3816_v32  ;;  %2732 = vrsqrt.f32 %v1605_v24 }
 0x3a8   : > { %v2406_v4 = vpack.c.bf16 %v1257_v6, %v1257_v6  ;;  %v1243_v10 = vmul.f32 %v2729_v41, %v3819_v39  ;;  %v1601_v28 = vpop.xlane.xlu1 %1600 }
 0x3a9   : > { %1299 = vst.msk [vmem:[%s3554_s15 + $0x10] sm:$0xf] %vm1294_vm2, %v2407_v8  ;;  %v1260_v11 = vmul.f32 %v1252_v35, %v1244_v27  ;;  %v1607_v17 = vadd.f32 1e-05, %v1601_v28  ;;  %v1598_v19 = vpop.xlane.xlu0 %1597 }
 0x3aa   : > { %1298 = vst.msk [vmem:[%s3554_s15 + $0xc] sm:$0xf] %vm1294_vm2, %v2406_v4  ;;  %v1259_v51 = vmul.f32 %v1252_v35, %v1243_v10  ;;  %v1606_v32 = vadd.f32 1e-05, %v1598_v19 }
 0x3ab   : > { %v2731_v21 = vpop.eup %2730  ;;  %v2409_v34 = vpack.c.bf16 %v1260_v11, %v1260_v11  ;;  %2734 = vrsqrt.f32 %v1607_v17 }
 0x3ac   : > { %v1245_v22 = vmul.f32 %v2731_v21, %v3831_v43  ;;  %v2408_v39 = vpack.c.bf16 %v1259_v51, %v1259_v51  ;;  %2736 = vrsqrt.f32 %v1606_v32  ;;  %v1651_v48 = vpop.permute.xlu1 %1650 }
 0x3ad   : > { %1301 = vst.msk [vmem:[%s3554_s15 + $0x18] sm:$0xf] %vm1294_vm2, %v2409_v34  ;;  %v1604_v30 = vpop.xlane.xlu0 %1603  ;;  %v1672_v31 = vcombine.high %v1651_v48, %v3051_v37  ;;  %v1679_v36 = vrot.slane %v1651_v48, %v3608_v12 }
 0x3ae   : > { %v1261_v26 = vmul.f32 %v1252_v35, %v1245_v22  ;;  %1300 = vst.msk [vmem:[%s3554_s15 + $0x14] sm:$0xf] %vm1294_vm2, %v2408_v39  ;;  %v1608_v43 = vadd.f32 1e-05, %v1604_v30  ;;  %v2369_v35 = vld [vmem:[%s4197_s1] ss:$0 sm:$0xff] }
 0x3af   : > { %v1686_v40 = vrot.slane %v1672_v31, %v3608_v12  ;;  %v1687_v42 = vcombine.low %v2374_v23, %v1679_v36  ;;  %v1688_v45 = vcombine.high %v2374_v23, %v1679_v36 }
 0x3b0   : > { %v2410_v16 = vpack.c.bf16 %v1261_v26, %v1261_v26  ;;  %2738 = vrsqrt.f32 %v1608_v43 }
 0x3b1   : > { %v2733_v46 = vpop.eup %2732  ;;  %v1695_v47 = vrot.slane %v1687_v42, %v3613_v20  ;;  %v1702_v29 = vrot.slane %v1688_v45, %v3613_v20  ;;  %v1703_v49 = vcombine.low %v1671_v25, %v1686_v40  ;;  %v1704_v52 = vcombine.high %v1671_v25, %v1686_v40  ;;  %v1653_v54 = vpop.permute.xlu0 %1652 }
 0x3b2   : > { %1302 = vst.msk [vmem:[%s3554_s15 + $0x1c] sm:$0xf] %vm1294_vm2, %v2410_v16  ;;  %v1613_v9 = vmul.f32 %v2733_v46, %v3840_v59  ;;  %v1739_v13 = vcombine.high %v1653_v54, %v3051_v37  ;;  %v1746_v56 = vrot.slane %v1653_v54, %v3608_v12 }
 0x3b3   : > { %v1711_v44 = vrot.slane %v1703_v49, %v3613_v20  ;;  %v1718_v57 = vrot.slane %v1704_v52, %v3613_v20  ;;  %v1790_v58 = vcombine.low %v1695_v47, %v1702_v29  ;;  %v2376_v50 = vcombine.high %v1695_v47, %v1702_v29 }
 0x3b4   : > { %v1624_v60 = vmul.f32 %v2369_v35, %v1613_v9  ;;  %v1753_v62 = vrot.slane %v1739_v13, %v3608_v12  ;;  %v1754_v63 = vcombine.low %v2375_v53, %v1746_v56  ;;  %v1755_v1 = vcombine.high %v2375_v53, %v1746_v56 }
 0x3b5   : > { %v2735_v14 = vpop.eup %2734  ;;  %v1797_v2 = vrot.slane %v1790_v58, %v3608_v12  ;;  %v1805_v59 = vrot.slane %v2376_v50, %v3608_v12  ;;  %v1806_v37 = vcombine.low %v1711_v44, %v1718_v57  ;;  %v2377_v33 = vcombine.high %v1711_v44, %v1718_v57 }
 0x3b6   : > { %v2737_v61 = vpop.eup %2736  ;;  %v2411_v0 = vpack.c.bf16 %v1624_v60, %v1624_v60  ;;  %v1615_v24 = vmul.f32 %v2735_v14, %v3853_v5  ;;  %v1762_v3 = vrot.slane %v1754_v63, %v3613_v20  ;;  %v1769_v6 = vrot.slane %v1755_v1, %v3613_v20 }
 0x3b7   : > { %v1614_v41 = vmul.f32 %v2737_v61, %v3855_v7  ;;  %v1813_v8 = vrot.slane %v1806_v37, %v3608_v12  ;;  %v1821_v27 = vrot.slane %v2377_v33, %v3608_v12  ;;  %v1822_v4 = vcombine.low %v1797_v2, %v1805_v59 }
 0x3b8   : > { %1644 = vst.msk [vmem:[%s3556_s25] sm:$0xf] %vm1294_vm2, %v2411_v0  ;;  %v1626_v10 = vmul.f32 %v2369_v35, %v1615_v24  ;;  %v1770_v28 = vcombine.low %v1738_v55, %v1753_v62  ;;  %v1771_v15 = vcombine.high %v1738_v55, %v1753_v62  ;;  %v1840_v11 = vcombine.low %v1762_v3, %v1769_v6 }
 0x3b9   : > { %v1625_v17 = vmul.f32 %v2369_v35, %v1614_v41  ;;  %v1829_v5 = vrot.slane %v1822_v4, %v3613_v20  ;;  %v1830_v19 = vcombine.low %v1813_v8, %v1821_v27  ;;  %v2378_v21 = vcombine.high %v1762_v3, %v1769_v6 }
 0x3ba   : > { %v2739_v51 = vpop.eup %2738  ;;  %v2413_v7 = vpack.c.bf16 %v1626_v10, %v1626_v10  ;;  %v1778_v32 = vrot.slane %v1770_v28, %v3613_v20  ;;  %v1785_v34 = vrot.slane %v1771_v15, %v3613_v20  ;;  %v1847_v22 = vrot.slane %v1840_v11, %v3608_v12 }
 0x3bb   : > { %v2412_v39 = vpack.c.bf16 %v1625_v17, %v1625_v17  ;;  %v1616_v23 = vmul.f32 %v2739_v51, %v3867_v18  ;;  %v1837_v48 = vrot.slane %v1830_v19, %v3613_v20  ;;  %v1855_v25 = vrot.slane %v2378_v21, %v3608_v12 }
 0x3bc   : > { %1646 = vst.msk [vmem:[%s3556_s25 + $0x8] sm:$0xf] %vm1294_vm2, %v2413_v7  ;;  %v1856_v26 = vcombine.low %v1778_v32, %v1785_v34  ;;  %v2379_v30 = vcombine.high %v1778_v32, %v1785_v34 }
 0x3bd   : > { %1645 = vst.msk [vmem:[%s3556_s25 + $0x4] sm:$0xf] %vm1294_vm2, %v2412_v39  ;;  %v1627_v31 = vmul.f32 %v2369_v35, %v1616_v23  ;;  %v1838_v36 = vcombine.low %v1829_v5, %v1837_v48  ;;  %v1839_v38 = vcombine.high %v1829_v5, %v1837_v48  ;;  %v1872_v16 = vcombine.low %v1847_v22, %v1855_v25 }
 0x3be   : > { %v1863_v43 = vrot.slane %v1856_v26, %v3608_v12  ;;  %v1871_v18 = vrot.slane %v2379_v30, %v3608_v12 }
 0x3bf   : > { %v2414_v40 = vpack.c.bf16 %v1627_v31, %v1627_v31  ;;  %v2415_v42 = vpack.c.bf16 %v1838_v36, %v1838_v36  ;;  %v2417_v45 = vpack.c.bf16 %v1839_v38, %v1839_v38  ;;  %v1879_v35 = vrot.slane %v1872_v16, %v3613_v20 }
 0x3c0   : > { %v1880_v46 = vcombine.low %v1863_v43, %v1871_v18 }
 0x3c1   : > { %1647 = vst.msk [vmem:[%s3556_s25 + $0xc] sm:$0xf] %vm1294_vm2, %v2414_v40  ;;  %1906 = vst.msk [vmem:[%s3558_s2] sm:$0xf] %vm1294_vm2, %v2415_v42 }
 0x3c2   : > { %1908 = vst.msk [vmem:[%s3558_s2 + $0x8] sm:$0xf] %vm1294_vm2, %v2417_v45  ;;  %v1887_v47 = vrot.slane %v1880_v46, %v3613_v20 }
 0x3c4   : > { %v1888_v29 = vcombine.low %v1879_v35, %v1887_v47  ;;  %v1889_v49 = vcombine.high %v1879_v35, %v1887_v47 }
 0x3c6   : > { %v2416_v52 = vpack.c.bf16 %v1888_v29, %v1888_v29  ;;  %v2418_v12 = vpack.c.bf16 %v1889_v49, %v1889_v49 }
 0x3c8   : > { %1907 = vst.msk [vmem:[%s3558_s2 + $0x4] sm:$0xf] %vm1294_vm2, %v2416_v52  ;;  %1909 = vst.msk [vmem:[%s3558_s2 + $0xc] sm:$0xf] %vm1294_vm2, %v2418_v12 }
 0x3c9 PF: > { %s1911_s27 = scalar_lea.sflag [#allocation5], %s3550_s21  ;;  %s3966_s0 = scalar_lea.sflag [#allocation13], %s388_s6 }
 0x3ca   : > { %s4198_s11 = sld [smem:[#allocation33_spill]]  ;;  %s4199_s23 = sld [smem:[#allocation34_spill]] }
 0x3cb   : > { %s4200_s9 = sld [smem:[#allocation38_spill]]  ;;  %s1952_s7 = sshll.u32 %s3554_s15, 4  ;;  %s1953_s7 = int_to_ptr.vmem [resolvable:$true] %s1952_s7 }
 0x3cc   : > { %s4201_s6 = sld [smem:[#allocation50_spill]]  ;;  %s3054_s1 = smov 128  }
 0x3cd   : > { %s3055_s3 = smov 256   ;;  %s3056_s4 = smov 2  }
 0x3ce   : > { %s3058_s15 = smov 4  }
 0x3d0   : > { %s2387_s24 = sshll.u32 %s4198_s11, 1  ;;  %s2388_s10 = sshll.u32 %s4199_s23, 4 }
 0x3d1   : > { %s1933_s8 = sadd.s32 %s2388_s10, %s2387_s24  ;;  %p4202_p10 = scmp.ne.s32.totalorder %s4200_s9, 0 }
 0x3d2   : > { %s2389_s13 = sshll.u32 %s1933_s8, 6  ;;  %s3057_s11 = smov 64  }
 0x3d3   : > { %s1935_s30 = scalar_lea.hbm %s4201_s6, %s2389_s13  ;;  %2427 = sst [smem:[#allocation16]] (%p4202_p10), %s3054_s1 }
 0x3d4   : > { %2428 = sst [smem:[#allocation16 + $0x1]] (%p4202_p10), %s3055_s3  ;;  %s3059_s10 = smov [#allocation15]  }
 0x3d5   : > { %2429 = sst [smem:[#allocation16 + $0x2]] (%p4202_p10), %s3056_s4  ;;  %s3060_s8 = smov 0  }
 0x3d6   : > { %2430 = sst [smem:[#allocation16 + $0x3]] (%p4202_p10), %s3057_s11 }
 0x3d7   : > { %2431 = sst [smem:[#allocation16 + $0x4]] (%p4202_p10), %s3057_s11 }
 0x3d8   : > { %2432 = sst [smem:[#allocation16 + $0x5]] (%p4202_p10), %s3058_s15 }
 0x3d9   : > { %2433 = dma.general (%p4202_p10), %s1953_s7, 512, %s1935_s30, %s1911_s27, %s3059_s10, [#allocation16], %s3060_s8, 0  }
 0x3da   : > { %s2391_s4 = sshll.u32 %s4199_s23, 3  ;;  %s1999_s3 = sshll.u32 %s3556_s25, 4  ;;  %s2000_s3 = int_to_ptr.vmem [resolvable:$true] %s1999_s3 }
 0x3db   : > { %s1980_s1 = sadd.s32 %s2391_s4, %s2387_s24  ;;  %s4203_s6 = sld [smem:[#allocation51_spill]] }
 0x3dc   : > { %s2392_s13 = sshll.u32 %s1980_s1, 6  ;;  %s3061_s27 = smov 128  }
 0x3dd   : > { %2434 = sst [smem:[#allocation18]] (%p4202_p10), %s3061_s27  ;;  %s3062_s7 = smov 256  }
 0x3de   : > { %2435 = sst [smem:[#allocation18 + $0x1]] (%p4202_p10), %s3062_s7  ;;  %s3063_s30 = smov 2  }
 0x3df   : > { %2436 = sst [smem:[#allocation18 + $0x2]] (%p4202_p10), %s3063_s30  ;;  %s3064_s23 = smov 64  }
 0x3e0   : > { %2437 = sst [smem:[#allocation18 + $0x3]] (%p4202_p10), %s3064_s23  ;;  %s3065_s25 = smov 4  }
 0x3e1   : > { %s1982_s11 = scalar_lea.hbm %s4203_s6, %s2392_s13  ;;  %2438 = sst [smem:[#allocation18 + $0x4]] (%p4202_p10), %s3064_s23 }
 0x3e2   : > { %2439 = sst [smem:[#allocation18 + $0x5]] (%p4202_p10), %s3065_s25  ;;  %s3066_s24 = smov [#allocation17]  }
 0x3e3   : > { %s3067_s15 = smov 0  }
 0x3e4   : > { %2440 = dma.general (%p4202_p10), %s2000_s3, 256, %s1982_s11, %s3966_s0, %s3066_s24, [#allocation18], %s3067_s15, 0  }
 0x3e5   : > { %s4204_s4 = sld [smem:[#allocation52_spill]]  ;;  %s2046_s21 = sshll.u32 %s3558_s2, 4  ;;  %s2047_s21 = int_to_ptr.vmem [resolvable:$true] %s2046_s21 }
 0x3e6   : > { %s3068_s20 = smov 128   ;;  %s3069_s6 = smov 256  }
 0x3e7   : > { %2441 = sst [smem:[#allocation20]] (%p4202_p10), %s3068_s20  ;;  %s3070_s3 = smov 2  }
 0x3e8   : > { %2442 = sst [smem:[#allocation20 + $0x1]] (%p4202_p10), %s3069_s6  ;;  %s3071_s11 = smov 64  }
 0x3e9   : > { %2443 = sst [smem:[#allocation20 + $0x2]] (%p4202_p10), %s3070_s3  ;;  %s3072_s27 = smov 4  }
 0x3ea   : > { %2444 = sst [smem:[#allocation20 + $0x3]] (%p4202_p10), %s3071_s11  ;;  %s3074_s2 = smov 0  }
 0x3eb   : > { %s2029_s1 = scalar_lea.hbm %s4204_s4, %s2392_s13  ;;  %2445 = sst [smem:[#allocation20 + $0x4]] (%p4202_p10), %s3071_s11 }
 0x3ec   : > { %2446 = sst [smem:[#allocation20 + $0x5]] (%p4202_p10), %s3072_s27  ;;  %s3073_s13 = smov [#allocation19]  }
 0x3ed   : > { %2447 = dma.general (%p4202_p10), %s2047_s21, 256, %s2029_s1, %s3966_s0, %s3073_s13, [#allocation20], %s3074_s2, 0  }
 0x3ee PF: > { %s4205_s7 = sld [smem:[#allocation27_spill]]  ;;  %s4206_s30 = sld [smem:[#allocation39_spill]] }
 0x3ef   : > { %p2475_p9 = scmp.ge.s32.totalorder %s3034_s19, 2 }
 0x3f4   : > { %s2074_s23 = sand.u32 1, %s4205_s7   ;;  %p4207_p4 = scmp.ne.s32.totalorder %s4206_s30, 0 }
 0x3f5   : > { %s2075_s25 = scalar_lea.sflag [#allocation5], %s2074_s23 }
 0x3f6   : > { %p2465_p3 = pnand %p2475_p9, %p4207_p4 }
 0x3f8   : > { %2953 = dma.done.wait (!%p2465_p3), %s2075_s25, 512  }
 0x3f9   : > { %2955 = vsyncadd (!%p2465_p3), %s2075_s25, 4294966784  ;;  %s4208_s24 = sadd.s32 4294967294, %s3034_s19  }
 0x3fa   : > { %s2083_s15 = sand.u32 1, %s4208_s24  }
 0x3fb   : > { %s2084_s10 = scalar_lea.sflag [#allocation13], %s2083_s15 }
 0x3fc   : > { %2957 = dma.done.wait (!%p2465_p3), %s2084_s10, 512  }
 0x3fd   : > { %2959 = vsyncadd (!%p2465_p3), %s2084_s10, 4294966784  ;;  %s33_s19 = sadd.s32 1, %s3034_s19   ;;  %s4210_s24 = sld [smem:[#allocation28_spill]] }
 0x3fe   : > { %p4034_p0 = scmp.ge.s32.totalorder %s33_s19, 10   ;;  %s4211_s30 = sld [smem:[#allocation29_spill]] }
 0x3ff   : > { %s4212_s8 = sld [smem:[#allocation30_spill]]  ;;  %s4213_s9 = sld [smem:[#allocation37_spill]] }
 0x400   : > { %s4214_s10 = sld [smem:[#allocation31_spill]]  ;;  %s4215_s4 = sld [smem:[#allocation35_spill]] }
 0x401   : > { %s4216_s1 = sld [smem:[#allocation42_spill]]  ;;  %s4217_s25 = smov %s2970_s26 }
 0x402   : > { %s4218_s21 = sld [smem:[#allocation44_spill]]  ;;  %s4219_s26 = smov %s3356_s22 }
 0x403   : > { %s4220_s27 = smov %s2978_s28  ;;  %s4221_s28 = smov %s2982_s29 }
 0x404   : > { %s4222_s29 = smov %s3410_s5  ;;  %s4223_s11 = smov %s3006_s12 }
 0x405   : > { %s4224_s12 = smov %s3359_s14  ;;  %s4225_s13 = smov %s3022_s16 }
 0x406   : > { %s4226_s14 = smov %s3026_s17  ;;  %s4227_s15 = smov %s3030_s18 }
 0x407   : > { %s4228_s16 = smov %s4215_s4  ;;  %s4229_s17 = smov %s4216_s1 }
 0x408   : > { %s4230_s18 = smov %s4218_s21  ;;  %32 = sbr.rel (!%p4034_p0) target bundleno = 28 (0x1c), region = 177 }
 0x40f   :  { %2098 = vsyncpa [#allocation4], 1 }
 0x410   :  { %2100 = vsyncpa [#allocation4 + $0x1], 1 }
 0x411   :  { %2101 = vsyncpa [#allocation7], 1 }
 0x412   :  { %2103 = vsyncpa [#allocation7 + $0x1], 1 }
 0x413   :  { %2104 = vsyncpa [#allocation10], 1 }
 0x414   :  { %2106 = vsyncpa [#allocation10 + $0x1], 1 }
 0x415   :  { %2107 = vsyncpa [#allocation5], 1 }
 0x416   :  { %2109 = vsyncpa [#allocation5 + $0x1], 1 }
 0x417   :  { %2110 = vsyncpa [#allocation13], 1 }
 0x418   :  { %2112 = vsyncpa [#allocation13 + $0x1], 1 }

</bundles_post_ra>
